<compile_context>
chip_gen: v5e
topology: v5e:2x2
jax: 0.10.0
libtpu: 0.0.40
codegen_flags: <defaults>
</compile_context>

<pallas_src>
import jax
import jax.numpy as jnp
from jax import lax
from jax.experimental import pallas as pl
from jax.experimental.pallas import tpu as pltpu


def _fire_kernel(x_ref, ws_ref, bs_ref, wexp_ref, bexp_ref, out_ref,
                 pad_ref, col_ref):
    # x_ref:    (1, H, W, Cin)     one batch element (NHWC)
    # ws_ref:   (Cin, Cs)          squeeze 1x1 weight, bf16
    # bs_ref:   (1, Cs)            squeeze bias, f32
    # wexp_ref: (9*Cs, Ce1+Ce3)    packed expand weight (see pack_fire_params), bf16
    # bexp_ref: (1, Ce1+Ce3)       packed expand bias [be1, be3], f32
    # out_ref:  (1, H, W, Ce1+Ce3)
    # pad_ref:  (H+2, W+2, Cs)     zero-padded squeeze output (halo kept at 0)
    # col_ref:  (H, W, 9*Cs)       im2col buffer for the fused expand matmul
    _, H, W, Cin = x_ref.shape
    Cs = ws_ref.shape[1]
    Cout = wexp_ref.shape[1]

    # --- squeeze 1x1 conv + ReLU: channel matmul (bf16 MXU operands, f32 acc) ---
    x = x_ref[0].reshape(H * W, Cin).astype(jnp.bfloat16)
    s = jnp.dot(x, ws_ref[...], preferred_element_type=jnp.float32) + bs_ref[...]
    s = jnp.maximum(s, 0.0)                                   # (H*W, Cs) f32

    # --- zero only the 1-pixel halo (interior is fully overwritten below).
    # Done every step (not only at program_id==0) so it stays correct when the
    # parallel batch axis is sharded across TensorCores.
    zrow = jnp.zeros((1, W + 2, Cs), pad_ref.dtype)
    zcol = jnp.zeros((H + 2, 1, Cs), pad_ref.dtype)
    pad_ref[0:1] = zrow
    pad_ref[H + 1:H + 2] = zrow
    pad_ref[:, 0:1] = zcol
    pad_ref[:, W + 1:W + 2] = zcol
    pad_ref[1:H + 1, 1:W + 1, :] = s.reshape(H, W, Cs)

    # --- im2col: 9 shifted windows of the padded squeeze output, written into
    # the column buffer tap-by-tap (ref slices, nothing large kept live). ---
    for ky in range(3):
        for kx in range(3):
            k = 3 * ky + kx
            col_ref[:, :, k * Cs:(k + 1) * Cs] = pad_ref[ky:ky + H, kx:kx + W, :]

    # --- fused expand 1x1 + expand 3x3 (padding=1) + bias + ReLU:
    # one MXU call with K = 9*Cs against the packed weight. Columns [:Ce1]
    # are e1 (center-tap rows carry We1), columns [Ce1:] are e3. ---
    cols = col_ref[...].reshape(H * W, 9 * Cs).astype(jnp.bfloat16)
    acc = jnp.dot(cols, wexp_ref[...], preferred_element_type=jnp.float32)
    out = jnp.maximum(acc + bexp_ref[...], 0.0)               # (H*W, Cout) f32

    # Single lane-dense, full-width store of concat([e1, e3], channel axis).
    out_ref[0] = out.reshape(H, W, Cout).astype(out_ref.dtype)


def pack_fire_params(params):
    """Pack Fire parameters into the kernel's fused layout. Call ONCE, outside
    the hot path.

    params: (ws (Cin,Cs), bs (1,Cs), we1 (Cs,Ce1), be1 (1,Ce1),
             we3 (3,3,Cs,Ce3) in HWIO, be3 (1,Ce3))
    Returns (ws_bf16, bs_f32, wexp_bf16, bexp_f32) where
      wexp[k*Cs:(k+1)*Cs, Ce1:] = we3[ky, kx]   (k = 3*ky + kx)
      wexp[4*Cs:5*Cs,    :Ce1] = we1            (expand-1x1 rides the center tap)
    """
    ws, bs, we1, be1, we3, be3 = params
    Cs, Ce1 = we1.shape
    Ce3 = we3.shape[-1]
    w_e3 = we3.reshape(9 * Cs, Ce3)                               # tap-major rows
    w_e1 = jnp.zeros((9 * Cs, Ce1), we1.dtype).at[4 * Cs:5 * Cs].set(we1)
    wexp = jnp.concatenate([w_e1, w_e3], axis=1)                  # (9*Cs, Ce1+Ce3)
    bexp = jnp.concatenate([be1, be3], axis=1)                    # (1, Ce1+Ce3)
    return (ws.astype(jnp.bfloat16), bs.astype(jnp.float32),
            wexp.astype(jnp.bfloat16), bexp.astype(jnp.float32))


def make_fire_forward_nhwc(x_nhwc, packed_params):
    """Fire-block forward, NHWC in / NHWC out (transpose-free hot path)."""
    ws, bs, wexp, bexp = packed_params
    B, H, W, Cin = x_nhwc.shape
    Cs = ws.shape[1]
    Cout = wexp.shape[1]

    return pl.pallas_call(
        _fire_kernel,
        out_shape=jax.ShapeDtypeStruct((B, H, W, Cout), x_nhwc.dtype),
        grid_spec=pltpu.PrefetchScalarGridSpec(
            num_scalar_prefetch=0,
            grid=(B,),
            in_specs=[
                pl.BlockSpec((1, H, W, Cin), lambda b: (b, 0, 0, 0)),
                pl.BlockSpec(ws.shape, lambda b: (0, 0)),
                pl.BlockSpec(bs.shape, lambda b: (0, 0)),
                pl.BlockSpec(wexp.shape, lambda b: (0, 0)),
                pl.BlockSpec(bexp.shape, lambda b: (0, 0)),
            ],
            out_specs=pl.BlockSpec((1, H, W, Cout), lambda b: (b, 0, 0, 0)),
            scratch_shapes=[
                pltpu.VMEM((H + 2, W + 2, Cs), jnp.float32),   # padded squeeze out
                pltpu.VMEM((H, W, 9 * Cs), jnp.float32),       # im2col buffer
            ],
        ),
        compiler_params=pltpu.CompilerParams(
            dimension_semantics=("parallel",),
            # Explicit scoped-VMEM budget: above v5e's 16 MiB default, below
            # v7x's 64 MiB physical capacity.
            vmem_limit_bytes=48 * 1024 * 1024,
        ),
    )(x_nhwc, ws, bs, wexp, bexp)


def make_fire_forward(x_nchw, params):
    """PyTorch-parity entry point: NCHW in, NCHW out (matches MakeFire.forward).

    The two transposes here are layout plumbing around the kernel; production
    code should call pack_fire_params once and use make_fire_forward_nhwc
    end-to-end to avoid the extra HBM round trips."""
    packed = pack_fire_params(params)
    x = jnp.transpose(x_nchw, (0, 2, 3, 1))                   # NCHW -> NHWC
    out = make_fire_forward_nhwc(x, packed)
    return jnp.transpose(out, (0, 3, 1, 2))                   # NHWC -> NCHW


def _reference_forward(x_nchw, params):
    """Pure-JAX reference (lax convs) for correctness checking."""
    ws, bs, we1, be1, we3, be3 = params
    x = jnp.transpose(x_nchw, (0, 2, 3, 1))                   # NHWC
    dn = ("NHWC", "HWIO", "NHWC")
    prec = lax.Precision.HIGHEST

    s = lax.conv_general_dilated(x, ws.reshape(1, 1, *ws.shape), (1, 1),
                                 "VALID", dimension_numbers=dn, precision=prec)
    s = jnp.maximum(s + bs[0], 0.0)

    e1 = lax.conv_general_dilated(s, we1.reshape(1, 1, *we1.shape), (1, 1),
                                  "VALID", dimension_numbers=dn, precision=prec)
    e1 = jnp.maximum(e1 + be1[0], 0.0)

    e3 = lax.conv_general_dilated(s, we3, (1, 1), ((1, 1), (1, 1)),
                                  dimension_numbers=dn, precision=prec)
    e3 = jnp.maximum(e3 + be3[0], 0.0)

    out = jnp.concatenate([e1, e3], axis=-1)
    return jnp.transpose(out, (0, 3, 1, 2))                   # back to NCHW


def init_fire_params(key, in_channels, squeeze_channels,
                     expand1x1_channels, expand3x3_channels):
    """Deterministic synthetic parameters (not a checkpoint load).

    Note: a PyTorch Conv2d weight of shape (O, I, kh, kw) corresponds to the
    HWIO weights used here via transpose (kh, kw, I, O)."""
    k = jax.random.split(key, 6)
    ws = 0.2 * jax.random.normal(k[0], (in_channels, squeeze_channels), jnp.float32)
    bs = 0.1 * jax.random.normal(k[1], (1, squeeze_channels), jnp.float32)
    we1 = 0.2 * jax.random.normal(k[2], (squeeze_channels, expand1x1_channels), jnp.float32)
    be1 = 0.1 * jax.random.normal(k[3], (1, expand1x1_channels), jnp.float32)
    we3 = 0.2 * jax.random.normal(k[4], (3, 3, squeeze_channels, expand3x3_channels), jnp.float32)
    be3 = 0.1 * jax.random.normal(k[5], (1, expand3x3_channels), jnp.float32)
    return ws, bs, we1, be1, we3, be3


if __name__ == "__main__":
    key = jax.random.PRNGKey(0)
    k_x, k_p = jax.random.split(key)

    B, Cin, H, W = 2, 4, 16, 16
    squeeze_c, e1_c, e3_c = 8, 16, 16

    x = jax.random.normal(k_x, (B, Cin, H, W), jnp.float32)
    params = init_fire_params(k_p, Cin, squeeze_c, e1_c, e3_c)

    out = make_fire_forward(x, params)
    out = jax.block_until_ready(out)

    ref = jax.block_until_ready(_reference_forward(x, params))
    assert out.shape == (B, e1_c + e3_c, H, W), out.shape
    # Tolerance accounts for bf16 MXU operands (f32 accumulation) vs the
    # Precision.HIGHEST f32 reference.
    assert jnp.allclose(out, ref, atol=3e-2, rtol=3e-2), \
        f"max abs err {jnp.max(jnp.abs(out - ref))}"

    print("KERNEL_OK")
</pallas_src>

<mosaic_0001>
module attributes {stable_mosaic.version = 11 : i64} {
  func.func @_fire_kernel(%arg0: i32, %arg1: memref<1x16x16x4xf32, #tpu.memory_space<vmem>>, %arg2: memref<4x8xbf16, #tpu.memory_space<vmem>>, %arg3: memref<1x8xf32, #tpu.memory_space<vmem>>, %arg4: memref<72x32xbf16, #tpu.memory_space<vmem>>, %arg5: memref<1x32xf32, #tpu.memory_space<vmem>>, %arg6: memref<1x16x16x32xf32, #tpu.memory_space<vmem>>, %arg7: memref<18x18x8xf32, #tpu.memory_space<vmem>>, %arg8: memref<16x16x72xf32, #tpu.memory_space<vmem>>) attributes {dimension_semantics = [#tpu.dimension_semantics<parallel>], iteration_bounds = array<i64: 2>, scalar_prefetch = 0 : i64, scratch_operands = 2 : i64, tpu.core_type = #tpu.core_type<tc>, window_params = [{transform_indices = @transform_0, window_bounds = array<i64: 1, 16, 16, 4>}, {pipeline_mode = #tpu.pipeline_mode<synchronous>, transform_indices = @transform_1, window_bounds = array<i64: 4, 8>}, {pipeline_mode = #tpu.pipeline_mode<synchronous>, transform_indices = @transform_2, window_bounds = array<i64: 1, 8>}, {pipeline_mode = #tpu.pipeline_mode<synchronous>, transform_indices = @transform_3, window_bounds = array<i64: 72, 32>}, {pipeline_mode = #tpu.pipeline_mode<synchronous>, transform_indices = @transform_4, window_bounds = array<i64: 1, 32>}, {transform_indices = @transform_5, window_bounds = array<i64: 1, 16, 16, 32>}]} {
    %c0 = arith.constant 0 : index
    %c0_0 = arith.constant 0 : index
    %c0_1 = arith.constant 0 : index
    %c0_2 = arith.constant 0 : index
    %0 = vector.load %arg1[%c0, %c0_0, %c0_1, %c0_2] : memref<1x16x16x4xf32, #tpu.memory_space<vmem>>, vector<1x16x16x4xf32>
    %1 = vector.shape_cast %0 : vector<1x16x16x4xf32> to vector<16x16x4xf32>
    %2 = vector.shape_cast %1 : vector<16x16x4xf32> to vector<256x4xf32>
    %3 = arith.truncf %2 : vector<256x4xf32> to vector<256x4xbf16>
    %c0_3 = arith.constant 0 : index
    %c0_4 = arith.constant 0 : index
    %4 = vector.load %arg2[%c0_3, %c0_4] : memref<4x8xbf16, #tpu.memory_space<vmem>>, vector<4x8xbf16>
    %cst = arith.constant dense<0.000000e+00> : vector<256x8xf32>
    %5 = tpu.matmul %3, %4, %cst {dimension_numbers = #tpu.dot_dimension_numbers<[1], [0], [0], [1], [0, 0, 1, 1], [], []>} : vector<256x4xbf16>, vector<4x8xbf16>, vector<256x8xf32> -> vector<256x8xf32>
    %c0_5 = arith.constant 0 : index
    %c0_6 = arith.constant 0 : index
    %6 = vector.load %arg3[%c0_5, %c0_6] : memref<1x8xf32, #tpu.memory_space<vmem>>, vector<1x8xf32>
    %7 = vector.broadcast %6 : vector<1x8xf32> to vector<256x8xf32>
    %8 = arith.addf %5, %7 : vector<256x8xf32>
    %cst_7 = arith.constant 0.000000e+00 : f32
    %9 = vector.broadcast %cst_7 : f32 to vector<256x8xf32>
    %10 = arith.maximumf %8, %9 : vector<256x8xf32>
    %cst_8 = arith.constant 0.000000e+00 : f32
    %11 = vector.broadcast %cst_8 : f32 to vector<1x18x8xf32>
    %cst_9 = arith.constant 0.000000e+00 : f32
    %12 = vector.broadcast %cst_9 : f32 to vector<18x1x8xf32>
    %c0_10 = arith.constant 0 : index
    %c0_11 = arith.constant 0 : index
    %c0_12 = arith.constant 0 : index
    %13 = vector.load %arg7[%c0_10, %c0_11, %c0_12] : memref<18x18x8xf32, #tpu.memory_space<vmem>>, vector<1x18x8xf32>
    tpu.vector_store %arg7[%c0_10, %c0_11, %c0_12], %11 {strides = array<i32>} : memref<18x18x8xf32, #tpu.memory_space<vmem>>, vector<1x18x8xf32>,
    %c17 = arith.constant 17 : index
    %c0_13 = arith.constant 0 : index
    %c0_14 = arith.constant 0 : index
    %14 = vector.load %arg7[%c17, %c0_13, %c0_14] : memref<18x18x8xf32, #tpu.memory_space<vmem>>, vector<1x18x8xf32>
    tpu.vector_store %arg7[%c17, %c0_13, %c0_14], %11 {strides = array<i32>} : memref<18x18x8xf32, #tpu.memory_space<vmem>>, vector<1x18x8xf32>,
    %c0_15 = arith.constant 0 : index
    %c0_16 = arith.constant 0 : index
    %c0_17 = arith.constant 0 : index
    %15 = vector.load %arg7[%c0_15, %c0_16, %c0_17] : memref<18x18x8xf32, #tpu.memory_space<vmem>>, vector<18x1x8xf32>
    tpu.vector_store %arg7[%c0_15, %c0_16, %c0_17], %12 {strides = array<i32>} : memref<18x18x8xf32, #tpu.memory_space<vmem>>, vector<18x1x8xf32>,
    %c0_18 = arith.constant 0 : index
    %c17_19 = arith.constant 17 : index
    %c0_20 = arith.constant 0 : index
    %16 = vector.load %arg7[%c0_18, %c17_19, %c0_20] : memref<18x18x8xf32, #tpu.memory_space<vmem>>, vector<18x1x8xf32>
    tpu.vector_store %arg7[%c0_18, %c17_19, %c0_20], %12 {strides = array<i32>} : memref<18x18x8xf32, #tpu.memory_space<vmem>>, vector<18x1x8xf32>,
    %17 = vector.shape_cast %10 : vector<256x8xf32> to vector<16x16x8xf32>
    %c1 = arith.constant 1 : index
    %c1_21 = arith.constant 1 : index
    %c0_22 = arith.constant 0 : index
    %18 = vector.load %arg7[%c1, %c1_21, %c0_22] : memref<18x18x8xf32, #tpu.memory_space<vmem>>, vector<16x16x8xf32>
    tpu.vector_store %arg7[%c1, %c1_21, %c0_22], %17 {strides = array<i32>} : memref<18x18x8xf32, #tpu.memory_space<vmem>>, vector<16x16x8xf32>,
    %c0_23 = arith.constant 0 : index
    %c0_24 = arith.constant 0 : index
    %c0_25 = arith.constant 0 : index
    %19 = vector.load %arg7[%c0_23, %c0_24, %c0_25] : memref<18x18x8xf32, #tpu.memory_space<vmem>>, vector<16x16x8xf32>
    %c0_26 = arith.constant 0 : index
    %c0_27 = arith.constant 0 : index
    %c0_28 = arith.constant 0 : index
    %20 = vector.load %arg8[%c0_26, %c0_27, %c0_28] : memref<16x16x72xf32, #tpu.memory_space<vmem>>, vector<16x16x8xf32>
    tpu.vector_store %arg8[%c0_26, %c0_27, %c0_28], %19 {strides = array<i32>} : memref<16x16x72xf32, #tpu.memory_space<vmem>>, vector<16x16x8xf32>,
    %c0_29 = arith.constant 0 : index
    %c1_30 = arith.constant 1 : index
    %c0_31 = arith.constant 0 : index
    %21 = vector.load %arg7[%c0_29, %c1_30, %c0_31] : memref<18x18x8xf32, #tpu.memory_space<vmem>>, vector<16x16x8xf32>
    %c0_32 = arith.constant 0 : index
    %c0_33 = arith.constant 0 : index
    %c8 = arith.constant 8 : index
    %22 = vector.load %arg8[%c0_32, %c0_33, %c8] : memref<16x16x72xf32, #tpu.memory_space<vmem>>, vector<16x16x8xf32>
    tpu.vector_store %arg8[%c0_32, %c0_33, %c8], %21 {strides = array<i32>} : memref<16x16x72xf32, #tpu.memory_space<vmem>>, vector<16x16x8xf32>,
    %c0_34 = arith.constant 0 : index
    %c2 = arith.constant 2 : index
    %c0_35 = arith.constant 0 : index
    %23 = vector.load %arg7[%c0_34, %c2, %c0_35] : memref<18x18x8xf32, #tpu.memory_space<vmem>>, vector<16x16x8xf32>
    %c0_36 = arith.constant 0 : index
    %c0_37 = arith.constant 0 : index
    %c16 = arith.constant 16 : index
    %24 = vector.load %arg8[%c0_36, %c0_37, %c16] : memref<16x16x72xf32, #tpu.memory_space<vmem>>, vector<16x16x8xf32>
    tpu.vector_store %arg8[%c0_36, %c0_37, %c16], %23 {strides = array<i32>} : memref<16x16x72xf32, #tpu.memory_space<vmem>>, vector<16x16x8xf32>,
    %c1_38 = arith.constant 1 : index
    %c0_39 = arith.constant 0 : index
    %c0_40 = arith.constant 0 : index
    %25 = vector.load %arg7[%c1_38, %c0_39, %c0_40] : memref<18x18x8xf32, #tpu.memory_space<vmem>>, vector<16x16x8xf32>
    %c0_41 = arith.constant 0 : index
    %c0_42 = arith.constant 0 : index
    %c24 = arith.constant 24 : index
    %26 = vector.load %arg8[%c0_41, %c0_42, %c24] : memref<16x16x72xf32, #tpu.memory_space<vmem>>, vector<16x16x8xf32>
    tpu.vector_store %arg8[%c0_41, %c0_42, %c24], %25 {strides = array<i32>} : memref<16x16x72xf32, #tpu.memory_space<vmem>>, vector<16x16x8xf32>,
    %c1_43 = arith.constant 1 : index
    %c1_44 = arith.constant 1 : index
    %c0_45 = arith.constant 0 : index
    %27 = vector.load %arg7[%c1_43, %c1_44, %c0_45] : memref<18x18x8xf32, #tpu.memory_space<vmem>>, vector<16x16x8xf32>
    %c0_46 = arith.constant 0 : index
    %c0_47 = arith.constant 0 : index
    %c32 = arith.constant 32 : index
    %28 = vector.load %arg8[%c0_46, %c0_47, %c32] : memref<16x16x72xf32, #tpu.memory_space<vmem>>, vector<16x16x8xf32>
    tpu.vector_store %arg8[%c0_46, %c0_47, %c32], %27 {strides = array<i32>} : memref<16x16x72xf32, #tpu.memory_space<vmem>>, vector<16x16x8xf32>,
    %c1_48 = arith.constant 1 : index
    %c2_49 = arith.constant 2 : index
    %c0_50 = arith.constant 0 : index
    %29 = vector.load %arg7[%c1_48, %c2_49, %c0_50] : memref<18x18x8xf32, #tpu.memory_space<vmem>>, vector<16x16x8xf32>
    %c0_51 = arith.constant 0 : index
    %c0_52 = arith.constant 0 : index
    %c40 = arith.constant 40 : index
    %30 = vector.load %arg8[%c0_51, %c0_52, %c40] : memref<16x16x72xf32, #tpu.memory_space<vmem>>, vector<16x16x8xf32>
    tpu.vector_store %arg8[%c0_51, %c0_52, %c40], %29 {strides = array<i32>} : memref<16x16x72xf32, #tpu.memory_space<vmem>>, vector<16x16x8xf32>,
    %c2_53 = arith.constant 2 : index
    %c0_54 = arith.constant 0 : index
    %c0_55 = arith.constant 0 : index
    %31 = vector.load %arg7[%c2_53, %c0_54, %c0_55] : memref<18x18x8xf32, #tpu.memory_space<vmem>>, vector<16x16x8xf32>
    %c0_56 = arith.constant 0 : index
    %c0_57 = arith.constant 0 : index
    %c48 = arith.constant 48 : index
    %32 = vector.load %arg8[%c0_56, %c0_57, %c48] : memref<16x16x72xf32, #tpu.memory_space<vmem>>, vector<16x16x8xf32>
    tpu.vector_store %arg8[%c0_56, %c0_57, %c48], %31 {strides = array<i32>} : memref<16x16x72xf32, #tpu.memory_space<vmem>>, vector<16x16x8xf32>,
    %c2_58 = arith.constant 2 : index
    %c1_59 = arith.constant 1 : index
    %c0_60 = arith.constant 0 : index
    %33 = vector.load %arg7[%c2_58, %c1_59, %c0_60] : memref<18x18x8xf32, #tpu.memory_space<vmem>>, vector<16x16x8xf32>
    %c0_61 = arith.constant 0 : index
    %c0_62 = arith.constant 0 : index
    %c56 = arith.constant 56 : index
    %34 = vector.load %arg8[%c0_61, %c0_62, %c56] : memref<16x16x72xf32, #tpu.memory_space<vmem>>, vector<16x16x8xf32>
    tpu.vector_store %arg8[%c0_61, %c0_62, %c56], %33 {strides = array<i32>} : memref<16x16x72xf32, #tpu.memory_space<vmem>>, vector<16x16x8xf32>,
    %c2_63 = arith.constant 2 : index
    %c2_64 = arith.constant 2 : index
    %c0_65 = arith.constant 0 : index
    %35 = vector.load %arg7[%c2_63, %c2_64, %c0_65] : memref<18x18x8xf32, #tpu.memory_space<vmem>>, vector<16x16x8xf32>
    %c0_66 = arith.constant 0 : index
    %c0_67 = arith.constant 0 : index
    %c64 = arith.constant 64 : index
    %36 = vector.load %arg8[%c0_66, %c0_67, %c64] : memref<16x16x72xf32, #tpu.memory_space<vmem>>, vector<16x16x8xf32>
    tpu.vector_store %arg8[%c0_66, %c0_67, %c64], %35 {strides = array<i32>} : memref<16x16x72xf32, #tpu.memory_space<vmem>>, vector<16x16x8xf32>,
    %c0_68 = arith.constant 0 : index
    %c0_69 = arith.constant 0 : index
    %c0_70 = arith.constant 0 : index
    %37 = vector.load %arg8[%c0_68, %c0_69, %c0_70] : memref<16x16x72xf32, #tpu.memory_space<vmem>>, vector<16x16x72xf32>
    %38 = vector.shape_cast %37 : vector<16x16x72xf32> to vector<256x72xf32>
    %39 = arith.truncf %38 : vector<256x72xf32> to vector<256x72xbf16>
    %c0_71 = arith.constant 0 : index
    %c0_72 = arith.constant 0 : index
    %40 = vector.load %arg4[%c0_71, %c0_72] : memref<72x32xbf16, #tpu.memory_space<vmem>>, vector<72x32xbf16>
    %cst_73 = arith.constant dense<0.000000e+00> : vector<256x32xf32>
    %41 = tpu.matmul %39, %40, %cst_73 {dimension_numbers = #tpu.dot_dimension_numbers<[1], [0], [0], [1], [0, 0, 1, 1], [], []>} : vector<256x72xbf16>, vector<72x32xbf16>, vector<256x32xf32> -> vector<256x32xf32>
    %c0_74 = arith.constant 0 : index
    %c0_75 = arith.constant 0 : index
    %42 = vector.load %arg5[%c0_74, %c0_75] : memref<1x32xf32, #tpu.memory_space<vmem>>, vector<1x32xf32>
    %43 = vector.broadcast %42 : vector<1x32xf32> to vector<256x32xf32>
    %44 = arith.addf %41, %43 : vector<256x32xf32>
    %cst_76 = arith.constant 0.000000e+00 : f32
    %45 = vector.broadcast %cst_76 : f32 to vector<256x32xf32>
    %46 = arith.maximumf %44, %45 : vector<256x32xf32>
    %47 = vector.shape_cast %46 : vector<256x32xf32> to vector<16x16x32xf32>
    %c0_77 = arith.constant 0 : index
    %c0_78 = arith.constant 0 : index
    %c0_79 = arith.constant 0 : index
    %c0_80 = arith.constant 0 : index
    %48 = vector.load %arg6[%c0_77, %c0_78, %c0_79, %c0_80] : memref<1x16x16x32xf32, #tpu.memory_space<vmem>>, vector<1x16x16x32xf32>
    %49 = vector.shape_cast %48 : vector<1x16x16x32xf32> to vector<16x16x32xf32>
    %50 = vector.shape_cast %47 : vector<16x16x32xf32> to vector<1x16x16x32xf32>
    tpu.vector_store %arg6[%c0_77, %c0_78, %c0_79, %c0_80], %50 {strides = array<i32>} : memref<1x16x16x32xf32, #tpu.memory_space<vmem>>, vector<1x16x16x32xf32>,
    return
  }
  func.func @transform_0(%arg0: i32) -> (i32, i32, i32, i32) {
    %c0_i32 = arith.constant 0 : i32
    %c0_i32_0 = arith.constant 0 : i32
    %c0_i32_1 = arith.constant 0 : i32
    %c0_i32_2 = arith.constant 0 : i32
    return %arg0, %c0_i32, %c0_i32_0, %c0_i32_1 : i32, i32, i32, i32
  }
  func.func @transform_1(%arg0: i32) -> (i32, i32) {
    %c0_i32 = arith.constant 0 : i32
    %c0_i32_0 = arith.constant 0 : i32
    %c0_i32_1 = arith.constant 0 : i32
    return %c0_i32, %c0_i32_0 : i32, i32
  }
  func.func @transform_2(%arg0: i32) -> (i32, i32) {
    %c0_i32 = arith.constant 0 : i32
    %c0_i32_0 = arith.constant 0 : i32
    %c0_i32_1 = arith.constant 0 : i32
    return %c0_i32, %c0_i32_0 : i32, i32
  }
  func.func @transform_3(%arg0: i32) -> (i32, i32) {
    %c0_i32 = arith.constant 0 : i32
    %c0_i32_0 = arith.constant 0 : i32
    %c0_i32_1 = arith.constant 0 : i32
    return %c0_i32, %c0_i32_0 : i32, i32
  }
  func.func @transform_4(%arg0: i32) -> (i32, i32) {
    %c0_i32 = arith.constant 0 : i32
    %c0_i32_0 = arith.constant 0 : i32
    %c0_i32_1 = arith.constant 0 : i32
    return %c0_i32, %c0_i32_0 : i32, i32
  }
  func.func @transform_5(%arg0: i32) -> (i32, i32, i32, i32) {
    %c0_i32 = arith.constant 0 : i32
    %c0_i32_0 = arith.constant 0 : i32
    %c0_i32_1 = arith.constant 0 : i32
    %c0_i32_2 = arith.constant 0 : i32
    return %arg0, %c0_i32, %c0_i32_0, %c0_i32_1 : i32, i32, i32, i32
  }
}

</mosaic_0001>

<bundles_post_ra>
// kernel: tpu_custom_call.1
= control target key start
LH: loop header
LB: loop body
LE: loop exit
PB: predicated region body
PF: predicated region fallthrough
CT: control target
= control target key end

     0   :  { %10 = vsyncpa [#allocation5], 0  ;;  %s3938_s0 = inlined_call_operand.vmem [shape: f32[2,16,16,4], index: 0, kind: input, shape index: {}]   ;;  %s3939_s1 = inlined_call_operand.vmem [shape: bf16[4,8], index: 1, kind: input, shape index: {}]   ;;  %s3940_s2 = inlined_call_operand.vmem [shape: f32[1,8], index: 2, kind: input, shape index: {}]   ;;  %s3941_s3 = inlined_call_operand.vmem [shape: bf16[72,32], index: 3, kind: input, shape index: {}]   ;;  %s3942_s4 = inlined_call_operand.vmem [shape: f32[1,32], index: 4, kind: input, shape index: {}]   ;;  %s3943_s5 = inlined_call_operand.hbm [shape: f32[2,16,16,32], index: 5, kind: output, shape index: {}]  }
   0x1   :  { %12 = vsyncpa [#allocation5 + $0x1], 0  ;;  %s2739_s18 = smov 0   ;;  %s2741_s19 = smov 0  }
   0x2   :  { %s2743_s20 = smov 0   ;;  %s2745_s21 = smov 0  }
   0x3 LB: > { %s2760_s22 = sadd.s32 4294967295, %s2697_s21   ;;  %s2512_s23 = sadd.s32 4294967294, %s2697_s21   ;;  %s2697_s21 = sphi %s2745_s21, %s3949_s21   ;;  %s2693_s20 = sphi %s2743_s20, %s3948_s20   ;;  %s2689_s19 = sphi %s2741_s19, %s3947_s19   ;;  %s2685_s18 = sphi %s2739_s18, %s3946_s18  }
   0x4   : > { %s2764_s24 = sadd.s32 1, %s2697_s21   ;;  %s135_s25 = sadd.s32 1, %s2693_s20 }
   0x5   : > { %s132_s26 = ssub.s32 %s2697_s21, %s2764_s24  ;;  %p145_p0 = scmp.ne.s32.totalorder %s2693_s20, %s2689_s19 }
   0x6   : > { %p133_p1 = scmp.eq.s32.totalorder %s132_s26, 0  ;;  %p146_p2 = scmp.eq.s32.totalorder %s2760_s22, 1 }
   0x7   : > { %p151_p3 = scmp.ne.s32.totalorder %s2689_s19, %s2685_s18  ;;  %p152_p4 = scmp.eq.s32.totalorder %s2512_s23, 1 }
   0x8   : > { %s2775_s27 = scalar_select %p133_p1, %s2693_s20, %s135_s25  }
   0x9   : > { %p2777_p5 = por %p146_p2, %p145_p0  ;;  %p2781_p6 = por %p152_p4, %p151_p3 }
   0xa   : > { %p2515_p7 = scmp.ge.s32.totalorder %s2697_s21, 1  ;;  %p190_p8 = scmp.lt.s32.totalorder %s2697_s21, 3 }
   0xc   : > { %p191_p9 = pnand %p2515_p7, %p190_p8 }
   0xd   : > { %p218_p10 = scmp.lt.s32.totalorder (!%p191_p9), %s2760_s22, 1  ;;  %s2700_s12 = smov (!%p191_p9), 8  }
   0xe   : > { %194 = sbr.rel (%p191_p9) target bundleno = 1104 (0x450), region = 40  ;;  %s2701_s13 = smov (!%p191_p9), 16  }
   0xf   : > { %s2702_s16 = smov (!%p191_p9), 32   ;;  %s2703_s17 = smov (!%p191_p9), 24  }
  0x10   : > { %s2704_s23 = smov (!%p191_p9), 40   ;;  %s2705_s25 = smov (!%p191_p9), 56  }
  0x11   : > { %s2706_s26 = smov (!%p191_p9), 64   ;;  %s2707_s30 = smov (!%p191_p9), 48  }
  0x13   : > { %v272_v0 = vld [vmem:[%s3939_s1] sm:$0x3]  ;;  %vm326_vm0 = vcmask 1041408   ;;  %s219_s7 = scalar_select %p218_p10, %s2760_s22, 1  ;;  %vm277_vm1 = vcmask 31744   ;;  %vm451_vm2 = vcmask 64512  }
  0x14   : > { %v328_v1 = vsel %vm326_vm0, %v272_v0, 0  ;;  %v2699_v14 = vmov 0.0   ;;  %vm460_vm3 = vcmask 57344   ;;  %vm454_vm4 = vcmask 58368   ;;  %v2916_v37 = vld [vmem:[%s3940_s2] ss:$0 sm:$0xff] }
  0x15   : > { %337 = vmatpush.bf16.msra.mxu0 %v328_v1  ;;  %2578 = vmatpush.bf16.msra.mxu3 %v328_v1  ;;  %s2572_s8 = sshll.u32 %s219_s7, 8  ;;  %452 = vst.msk [vmem:[#allocation2] sm:$0xff] %vm451_vm2, %v2699_v14  ;;  %vm754_vm5 = vcmask 130112   ;;  %vm947_vm6 = vcmask 195712   ;;  %vm1140_vm7 = vcmask 261312   ;;  %vm1333_vm8 = vcmask 326912  }
  0x16   : > { %s2795_s11 = scalar_lea.vmem %s3938_s0, %s2572_s8  ;;  %453 = vst.msk [vmem:[#allocation2 + $0x8] sm:$0xff] %vm451_vm2, %v2699_v14  ;;  %vm1526_vm9 = vcmask 392512   ;;  %vm2276_vm10 = vcmask 1043456   ;;  %vm1720_vm11 = vcmask 458112   ;;  %vm1913_vm12 = vcmask 523712  }
  0x17   : > { %v224_v2 = vld [vmem:[%s2795_s11] sm:$0xff]  ;;  %v225_v3 = vld [vmem:[%s2795_s11 + $0x8] sm:$0xff]  ;;  %v242_v4 = vld [vmem:[%s2795_s11 + $0x90] sm:$0xff]  ;;  %461 = vst.msk [vmem:[#allocation2] sm:$0x1] %vm460_vm3, %v2699_v14  ;;  %vm2106_vm13 = vcmask 589312  }
  0x18   : > { %v256_v5 = vpack.c.bf16 %v225_v3, %v224_v2  ;;  %v243_v6 = vld [vmem:[%s2795_s11 + $0x98] sm:$0xff]  ;;  %v226_v8 = vld [vmem:[%s2795_s11 + $0x10] sm:$0xff]  ;;  %v244_v10 = vld [vmem:[%s2795_s11 + $0xa0] sm:$0xff]  ;;  %457 = vst.msk [vmem:[#allocation2 + $0x198] sm:$0xff] %vm451_vm2, %v2699_v14  ;;  %vm2227_vm14 = vcmask 588800   ;;  %vm2401_vm15 = vcmask 261120  }
  0x19   : > { %v265_v7 = vpack.c.bf16 %v243_v6, %v242_v4  ;;  %v227_v9 = vld [vmem:[%s2795_s11 + $0x18] sm:$0xff]  ;;  %v245_v11 = vld [vmem:[%s2795_s11 + $0xa8] sm:$0xff]  ;;  %458 = vst.msk [vmem:[#allocation2 + $0x1a0] sm:$0xff] %vm451_vm2, %v2699_v14  ;;  %v228_v15 = vld [vmem:[%s2795_s11 + $0x20] sm:$0xff] }
  0x1a   : > { %2519 = vmatmul.msk.bf16.vlgmr.msra.gmra.mxu0 %vm277_vm1, %v256_v5  ;;  %v257_v12 = vpack.c.bf16 %v227_v9, %v226_v8  ;;  %v266_v13 = vpack.c.bf16 %v245_v11, %v244_v10  ;;  %462 = vst.msk [vmem:[#allocation2 + $0x18] sm:$0x1] %vm460_vm3, %v2699_v14  ;;  %v229_v16 = vld [vmem:[%s2795_s11 + $0x28] sm:$0xff]  ;;  %v246_v17 = vld [vmem:[%s2795_s11 + $0xb0] sm:$0xff]  ;;  %v247_v18 = vld [vmem:[%s2795_s11 + $0xb8] sm:$0xff] }
  0x1b   : > { %2528 = vmatmul.msk.bf16.vlgmr.msra.gmra.mxu3 %vm277_vm1, %v265_v7  ;;  %463 = vst.msk [vmem:[#allocation2 + $0x30] sm:$0x1] %vm460_vm3, %v2699_v14  ;;  %v258_v20 = vpack.c.bf16 %v229_v16, %v228_v15  ;;  %v267_v21 = vpack.c.bf16 %v247_v18, %v246_v17  ;;  %v230_v22 = vld [vmem:[%s2795_s11 + $0x30] sm:$0xff]  ;;  %v231_v23 = vld [vmem:[%s2795_s11 + $0x38] sm:$0xff]  ;;  %v248_v24 = vld [vmem:[%s2795_s11 + $0xc0] sm:$0xff] }
  0x1c   : > { %464 = vst.msk [vmem:[#allocation2 + $0x48] sm:$0x1] %vm460_vm3, %v2699_v14  ;;  %v249_v25 = vld [vmem:[%s2795_s11 + $0xc8] sm:$0xff]  ;;  %v259_v26 = vpack.c.bf16 %v231_v23, %v230_v22  ;;  %v232_v30 = vld [vmem:[%s2795_s11 + $0x40] sm:$0xff]  ;;  %v250_v33 = vld [vmem:[%s2795_s11 + $0xd0] sm:$0xff] }
  0x1d   : > { %v594_v19 = vld [vmem:[#allocation2 + $0x1] sm:$0xff]  ;;  %465 = vst.msk [vmem:[#allocation2 + $0x60] sm:$0x1] %vm460_vm3, %v2699_v14  ;;  %v268_v27 = vpack.c.bf16 %v249_v25, %v248_v24  ;;  %v251_v34 = vld [vmem:[%s2795_s11 + $0xd8] sm:$0xff]  ;;  %v234_v49 = vld [vmem:[%s2795_s11 + $0x50] sm:$0xff] }
  0x1e   : > { %658 = vrot.lane.b32.xlu0 %v594_v19, %s2700_s12  ;;  %466 = vst.msk [vmem:[#allocation2 + $0x78] sm:$0x1] %vm460_vm3, %v2699_v14  ;;  %v233_v31 = vld [vmem:[%s2795_s11 + $0x48] sm:$0xff]  ;;  %v269_v35 = vpack.c.bf16 %v251_v34, %v250_v33  ;;  %v235_v50 = vld [vmem:[%s2795_s11 + $0x58] sm:$0xff]  ;;  %v252_v52 = vld [vmem:[%s2795_s11 + $0xe0] sm:$0xff] }
  0x1f   : > { %467 = vst.msk [vmem:[#allocation2 + $0x90] sm:$0x1] %vm460_vm3, %v2699_v14  ;;  %v260_v32 = vpack.c.bf16 %v233_v31, %v232_v30  ;;  %v787_v36 = vld [vmem:[#allocation2 + $0x2] sm:$0xff]  ;;  %v261_v51 = vpack.c.bf16 %v235_v50, %v234_v49  ;;  %v238_v50 = vld [vmem:[%s2795_s11 + $0x70] sm:$0xff] }
  0x20   : > { %468 = vst.msk [vmem:[#allocation2 + $0xa8] sm:$0x1] %vm460_vm3, %v2699_v14  ;;  %851 = vrot.lane.b32.xlu2 %v787_v36, %s2701_s13  ;;  %v253_v53 = vld [vmem:[%s2795_s11 + $0xe8] sm:$0xff]  ;;  %v530_v49 = vld [vmem:[#allocation2] sm:$0xff] }
  0x21   : > { %469 = vst.msk [vmem:[#allocation2 + $0xc0] sm:$0x1] %vm460_vm3, %v2699_v14  ;;  %v270_v55 = vpack.c.bf16 %v253_v53, %v252_v52  ;;  %v237_v33 = vld [vmem:[%s2795_s11 + $0x68] sm:$0xff] }
  0x22   : > { %470 = vst.msk [vmem:[#allocation2 + $0xd8] sm:$0x1] %vm460_vm3, %v2699_v14 }
  0x23   : > { %471 = vst.msk [vmem:[#allocation2 + $0xf0] sm:$0x1] %vm460_vm3, %v2699_v14 }
  0x24   : > { %472 = vst.msk [vmem:[#allocation2 + $0x108] sm:$0x1] %vm460_vm3, %v2699_v14 }
  0x25   : > { %473 = vst.msk [vmem:[#allocation2 + $0x120] sm:$0x1] %vm460_vm3, %v2699_v14 }
  0x26   : > { %474 = vst.msk [vmem:[#allocation2 + $0x138] sm:$0x1] %vm460_vm3, %v2699_v14 }
  0x27   : > { %475 = vst.msk [vmem:[#allocation2 + $0x150] sm:$0x1] %vm460_vm3, %v2699_v14 }
  0x28   : > { %476 = vst.msk [vmem:[#allocation2 + $0x168] sm:$0x1] %vm460_vm3, %v2699_v14 }
  0x29   : > { %477 = vst.msk [vmem:[#allocation2 + $0x180] sm:$0x1] %vm460_vm3, %v2699_v14 }
  0x2a   : > { %2520 = vmatmul.msk.bf16.gmra.mxu0 %vm277_vm1, %v257_v12  ;;  %480 = vst.msk [vmem:[#allocation2 + $0x29] sm:$0x1] %vm460_vm3, %v2699_v14 }
  0x2b   : > { %2529 = vmatmul.msk.bf16.gmra.mxu3 %vm277_vm1, %v266_v13  ;;  %481 = vst.msk [vmem:[#allocation2 + $0x41] sm:$0x1] %vm460_vm3, %v2699_v14 }
  0x2c   : > { %482 = vst.msk [vmem:[#allocation2 + $0x59] sm:$0x1] %vm460_vm3, %v2699_v14 }
  0x2d   : > { %483 = vst.msk [vmem:[#allocation2 + $0x71] sm:$0x1] %vm460_vm3, %v2699_v14 }
  0x2e   : > { %484 = vst.msk [vmem:[#allocation2 + $0x89] sm:$0x1] %vm460_vm3, %v2699_v14 }
  0x2f   : > { %485 = vst.msk [vmem:[#allocation2 + $0xa1] sm:$0x1] %vm460_vm3, %v2699_v14 }
  0x30   : > { %486 = vst.msk [vmem:[#allocation2 + $0xb9] sm:$0x1] %vm460_vm3, %v2699_v14 }
  0x31   : > { %487 = vst.msk [vmem:[#allocation2 + $0xd1] sm:$0x1] %vm460_vm3, %v2699_v14 }
  0x32   : > { %488 = vst.msk [vmem:[#allocation2 + $0xe9] sm:$0x1] %vm460_vm3, %v2699_v14 }
  0x33   : > { %489 = vst.msk [vmem:[#allocation2 + $0x101] sm:$0x1] %vm460_vm3, %v2699_v14 }
  0x34   : > { %490 = vst.msk [vmem:[#allocation2 + $0x119] sm:$0x1] %vm460_vm3, %v2699_v14 }
  0x35   : > { %491 = vst.msk [vmem:[#allocation2 + $0x131] sm:$0x1] %vm460_vm3, %v2699_v14 }
  0x36   : > { %492 = vst.msk [vmem:[#allocation2 + $0x149] sm:$0x1] %vm460_vm3, %v2699_v14 }
  0x37   : > { %493 = vst.msk [vmem:[#allocation2 + $0x161] sm:$0x1] %vm460_vm3, %v2699_v14 }
  0x38   : > { %494 = vst.msk [vmem:[#allocation2 + $0x179] sm:$0x1] %vm460_vm3, %v2699_v14 }
  0x39   : > { %495 = vst.msk [vmem:[#allocation2 + $0x191] sm:$0x1] %vm460_vm3, %v2699_v14 }
  0x3a   : > { %2521 = vmatmul.msk.bf16.gmra.mxu0 %vm277_vm1, %v258_v20  ;;  %455 = vst.msk [vmem:[#allocation2 + $0x10] sm:$0x3] %vm454_vm4, %v2699_v14 }
  0x3b   : > { %2530 = vmatmul.msk.bf16.gmra.mxu3 %vm277_vm1, %v267_v21  ;;  %459 = vst.msk [vmem:[#allocation2 + $0x1a8] sm:$0x3] %vm454_vm4, %v2699_v14 }
  0x3c   : > { %478 = vst.msk [vmem:[#allocation2 + $0x198] sm:$0x1] %vm460_vm3, %v2699_v14 }
  0x3d   : > { %479 = vst.msk [vmem:[#allocation2 + $0x11] sm:$0x1] %vm460_vm3, %v2699_v14 }
  0x3e   : > { %496 = vst.msk [vmem:[#allocation2 + $0x1a9] sm:$0x1] %vm460_vm3, %v2699_v14 }
  0x3f   : > { %562 = vst.msk [vmem:[#allocation3] sm:$0xff] %vm451_vm2, %v530_v49 }
  0x41   : > { %v595_v28 = vld [vmem:[#allocation2 + $0x9] sm:$0xff] }
  0x42   : > { %660 = vrot.lane.b32.xlu0 %v595_v28, %s2700_s12 }
  0x44   : > { %v788_v29 = vld [vmem:[#allocation2 + $0xa] sm:$0xff] }
  0x4a   : > { %2522 = vmatmul.msk.bf16.gmra.mxu0 %vm277_vm1, %v259_v26  ;;  %853 = vrot.lane.b32.xlu0 %v788_v29, %s2701_s13 }
  0x4b   : > { %2531 = vmatmul.msk.bf16.gmra.mxu3 %vm277_vm1, %v268_v27 }
  0x5a   : > { %2523 = vmatmul.msk.bf16.gmra.mxu0 %vm277_vm1, %v260_v32  ;;  %v236_v32 = vld [vmem:[%s2795_s11 + $0x60] sm:$0xff] }
  0x5b   : > { %2532 = vmatmul.msk.bf16.gmra.mxu3 %vm277_vm1, %v269_v35  ;;  %v262_v34 = vpack.c.bf16 %v237_v33, %v236_v32 }
  0x6a   : > { %2524 = vmatmul.msk.bf16.gmra.mxu0 %vm277_vm1, %v261_v51  ;;  %v239_v51 = vld [vmem:[%s2795_s11 + $0x78] sm:$0xff] }
  0x6b   : > { %2533 = vmatmul.msk.bf16.gmra.mxu3 %vm277_vm1, %v270_v55  ;;  %v263_v52 = vpack.c.bf16 %v239_v51, %v238_v50 }
  0x7a   : > { %2525 = vmatmul.msk.bf16.gmra.mxu0 %vm277_vm1, %v262_v34 }
  0x8a   : > { %2526 = vmatmul.msk.bf16.gmra.mxu0 %vm277_vm1, %v263_v52 }
  0x97   : > { %v339_v38 = vpop.f32.mrf.mxu0 }
  0x98   : > { %v340_v39 = vadd.f32 %v2916_v37, %v339_v38 }
  0x9a   : > { %v419_v40 = vmax.f32 %v340_v39, 0.0 }
  0x9c   : > { %498 = vst.msk [vmem:[#allocation2 + $0x19] sm:$0xff] %vm451_vm2, %v419_v40  ;;  %v254_v40 = vld [vmem:[%s2795_s11 + $0xf0] sm:$0xff] }
  0x9e   : > { %v384_v41 = vpop.f32.mrf.mxu3 }
  0x9f   : > { %v385_v42 = vadd.f32 %v2916_v37, %v384_v41  ;;  %v341_v43 = vpop.f32.mrf.mxu0  ;;  %v255_v41 = vld [vmem:[%s2795_s11 + $0xf8] sm:$0xff] }
  0xa0   : > { %v342_v44 = vadd.f32 %v2916_v37, %v341_v43  ;;  %v271_v43 = vpack.c.bf16 %v255_v41, %v254_v40 }
  0xa1   : > { %v437_v45 = vmax.f32 %v385_v42, 0.0 }
  0xa2   : > { %v420_v46 = vmax.f32 %v342_v44, 0.0  ;;  %2534 = vmatmul.msk.bf16.gmra.mxu3 %vm277_vm1, %v271_v43 }
  0xa3   : > { %516 = vst.msk [vmem:[#allocation2 + $0xf1] sm:$0xff] %vm451_vm2, %v437_v45  ;;  %v1173_v47 = vld [vmem:[#allocation2 + $0x19] sm:$0xff] }
  0xa4   : > { %v980_v48 = vld [vmem:[#allocation2 + $0x18] sm:$0xff]  ;;  %499 = vst.msk [vmem:[#allocation2 + $0x21] sm:$0xff] %vm451_vm2, %v420_v46  ;;  %1237 = vrot.lane.b32.xlu0 %v1173_v47, %s2702_s16  ;;  %662 = vrot.lane.b32.xlu1 %v1173_v47, %s2700_s12 }
  0xa5   : > { %564 = vst.msk [vmem:[#allocation3 + $0x10] sm:$0xff] %vm451_vm2, %v980_v48 }
  0xa6   : > { %v386_v54 = vpop.f32.mrf.mxu3 }
  0xa7   : > { %v387_v56 = vadd.f32 %v2916_v37, %v386_v54  ;;  %v344_v57 = vpop.f32.mrf.mxu0 }
  0xa8   : > { %v345_v58 = vadd.f32 %v2916_v37, %v344_v57 }
  0xa9   : > { %v438_v59 = vmax.f32 %v387_v56, 0.0  ;;  %v531_v56 = vld [vmem:[#allocation2 + $0x8] sm:$0xff] }
  0xaa   : > { %v614_v60 = vld [vmem:[#allocation2 + $0xf1] sm:$0xff]  ;;  %v421_v61 = vmax.f32 %v345_v58, 0.0  ;;  %563 = vst.msk [vmem:[#allocation3 + $0x8] sm:$0xff] %vm451_vm2, %v531_v56 }
  0xab   : > { %v998_v62 = vld [vmem:[#allocation2 + $0xf0] sm:$0xff]  ;;  %517 = vst.msk [vmem:[#allocation2 + $0xf9] sm:$0xff] %vm451_vm2, %v438_v59  ;;  %698 = vrot.lane.b32.xlu2 %v614_v60, %s2700_s12  ;;  %v981_v63 = vld [vmem:[#allocation2 + $0x20] sm:$0xff] }
  0xac   : > { %1044 = vrot.lane.b32.xlu1 %v980_v48, %s2703_s17  ;;  %500 = vst.msk [vmem:[#allocation2 + $0x31] sm:$0xff] %vm451_vm2, %v421_v61  ;;  %v790_v5 = vld [vmem:[#allocation2 + $0x22] sm:$0xff]  ;;  %v789_v26 = vld [vmem:[#allocation2 + $0x1a] sm:$0xff]  ;;  %v659_v48 = vpop.permute.xlu0 %658 }
  0xad   : > { %582 = vst.msk [vmem:[#allocation3 + $0xa0] sm:$0xff] %vm451_vm2, %v998_v62  ;;  %v597_v16 = vld [vmem:[#allocation2 + $0x21] sm:$0xff] }
  0xae   : > { %v389_v0 = vpop.f32.mrf.mxu3  ;;  %565 = vst.msk [vmem:[#allocation3 + $0x18] sm:$0xff] %vm451_vm2, %v981_v63 }
  0xaf   : > { %v390_v1 = vadd.f32 %v2916_v37, %v389_v0  ;;  %v346_v2 = vpop.f32.mrf.mxu0  ;;  %755 = vst.msk [vmem:[#allocation3] sm:$0xff] %vm754_vm5, %v659_v48  ;;  %v240_v0 = vld [vmem:[%s2795_s11 + $0x80] sm:$0xff] }
  0xb0   : > { %v347_v3 = vadd.f32 %v2916_v37, %v346_v2 }
  0xb1   : > { %v439_v4 = vmax.f32 %v390_v1, 0.0  ;;  %v241_v1 = vld [vmem:[%s2795_s11 + $0x88] sm:$0xff] }
  0xb2   : > { %v615_v6 = vld [vmem:[#allocation2 + $0xf9] sm:$0xff]  ;;  %v422_v7 = vmax.f32 %v347_v3, 0.0 }
  0xb3   : > { %v999_v8 = vld [vmem:[#allocation2 + $0xf8] sm:$0xff]  ;;  %857 = vrot.lane.b32.xlu2 %v790_v5, %s2701_s13  ;;  %700 = vrot.lane.b32.xlu0 %v615_v6, %s2700_s12  ;;  %518 = vst.msk [vmem:[#allocation2 + $0x109] sm:$0xff] %vm451_vm2, %v439_v4  ;;  %v982_v9 = vld [vmem:[#allocation2 + $0x30] sm:$0xff]  ;;  %v264_v4 = vpack.c.bf16 %v241_v1, %v240_v0 }
  0xb4   : > { %1080 = vrot.lane.b32.xlu1 %v998_v62, %s2703_s17  ;;  %501 = vst.msk [vmem:[#allocation2 + $0x39] sm:$0xff] %vm451_vm2, %v422_v7  ;;  %v808_v24 = vld [vmem:[#allocation2 + $0xfa] sm:$0xff]  ;;  %v598_v38 = vld [vmem:[#allocation2 + $0x31] sm:$0xff]  ;;  %v661_v57 = vpop.permute.xlu0 %660  ;;  %v852_v62 = vpop.permute.xlu2 %851 }
  0xb5   : > { %583 = vst.msk [vmem:[#allocation3 + $0xa8] sm:$0xff] %vm451_vm2, %v999_v8  ;;  %v807_v42 = vld [vmem:[#allocation2 + $0xf2] sm:$0xff]  ;;  %2527 = vmatmul.msk.bf16.gmra.mxu0 %vm277_vm1, %v264_v4 }
  0xb6   : > { %v391_v10 = vpop.f32.mrf.mxu3  ;;  %566 = vst.msk [vmem:[#allocation3 + $0x20] sm:$0xff] %vm451_vm2, %v982_v9 }
  0xb7   : > { %v392_v11 = vadd.f32 %v2916_v37, %v391_v10  ;;  %v349_v12 = vpop.f32.mrf.mxu0  ;;  %756 = vst.msk [vmem:[#allocation3 + $0x8] sm:$0xff] %vm754_vm5, %v661_v57 }
  0xb8   : > { %v350_v13 = vadd.f32 %v2916_v37, %v349_v12  ;;  %948 = vst.msk [vmem:[#allocation3] sm:$0xff] %vm947_vm6, %v852_v62 }
  0xb9   : > { %v440_v14 = vmax.f32 %v392_v11, 0.0 }
  0xba   : > { %v423_v15 = vmax.f32 %v350_v13, 0.0  ;;  %v1000_v18 = vld [vmem:[#allocation2 + $0x108] sm:$0xff] }
  0xbb   : > { %1048 = vrot.lane.b32.xlu0 %v982_v9, %s2703_s17  ;;  %1046 = vrot.lane.b32.xlu2 %v981_v63, %s2703_s17  ;;  %519 = vst.msk [vmem:[#allocation2 + $0x111] sm:$0xff] %vm451_vm2, %v440_v14  ;;  %v2957_v17 = vld [vmem:[#allocation2 + $0x38] sm:$0xff]  ;;  %v3002_v47 = vld [vmem:[#allocation2 + $0x109] sm:$0xff] }
  0xbc   : > { %664 = vrot.lane.b32.xlu1 %v597_v16, %s2700_s12  ;;  %502 = vst.msk [vmem:[#allocation2 + $0x49] sm:$0xff] %vm451_vm2, %v423_v15  ;;  %v791_v31 = vld [vmem:[#allocation2 + $0x32] sm:$0xff]  ;;  %v792_v54 = vld [vmem:[#allocation2 + $0x3a] sm:$0xff]  ;;  %v854_v6 = vpop.permute.xlu0 %853 }
  0xbd   : > { %567 = vst.msk [vmem:[#allocation3 + $0x28] sm:$0xff] %vm451_vm2, %v2957_v17  ;;  %v1176_v39 = vld [vmem:[#allocation2 + $0x39] sm:$0xff] }
  0xbe   : > { %v394_v19 = vpop.f32.mrf.mxu3  ;;  %584 = vst.msk [vmem:[#allocation3 + $0xb0] sm:$0xff] %vm451_vm2, %v1000_v18 }
  0xbf   : > { %v395_v20 = vadd.f32 %v2916_v37, %v394_v19  ;;  %v351_v21 = vpop.f32.mrf.mxu0  ;;  %949 = vst.msk [vmem:[#allocation3 + $0x8] sm:$0xff] %vm947_vm6, %v854_v6 }
  0xc0   : > { %v352_v22 = vadd.f32 %v2916_v37, %v351_v21 }
  0xc1   : > { %v441_v23 = vmax.f32 %v395_v20, 0.0 }
  0xc2   : > { %v424_v25 = vmax.f32 %v352_v22, 0.0  ;;  %v2967_v27 = vld [vmem:[#allocation2 + $0x110] sm:$0xff] }
  0xc3   : > { %1084 = vrot.lane.b32.xlu0 %v1000_v18, %s2703_s17  ;;  %893 = vrot.lane.b32.xlu2 %v808_v24, %s2701_s13  ;;  %520 = vst.msk [vmem:[#allocation2 + $0x121] sm:$0xff] %vm451_vm2, %v441_v23  ;;  %v2980_v35 = vld [vmem:[#allocation2 + $0x48] sm:$0xff]  ;;  %v3019_v61 = vld [vmem:[#allocation2 + $0x111] sm:$0xff] }
  0xc4   : > { %855 = vrot.lane.b32.xlu1 %v789_v26, %s2701_s13  ;;  %503 = vst.msk [vmem:[#allocation2 + $0x51] sm:$0xff] %vm451_vm2, %v424_v25  ;;  %v809_v46 = vld [vmem:[#allocation2 + $0x10a] sm:$0xff]  ;;  %v810_v10 = vld [vmem:[#allocation2 + $0x112] sm:$0xff] }
  0xc5   : > { %585 = vst.msk [vmem:[#allocation3 + $0xb8] sm:$0xff] %vm451_vm2, %v2967_v27  ;;  %v600_v53 = vld [vmem:[#allocation2 + $0x49] sm:$0xff] }
  0xc6   : > { %v396_v28 = vpop.f32.mrf.mxu3  ;;  %568 = vst.msk [vmem:[#allocation3 + $0x30] sm:$0xff] %vm451_vm2, %v2980_v35 }
  0xc7   : > { %v397_v29 = vadd.f32 %v2916_v37, %v396_v28  ;;  %v354_v55 = vpop.f32.mrf.mxu0 }
  0xc8   : > { %v355_v58 = vadd.f32 %v2916_v37, %v354_v55 }
  0xc9   : > { %v442_v30 = vmax.f32 %v397_v29, 0.0 }
  0xca   : > { %v1002_v44 = vld [vmem:[#allocation2 + $0x120] sm:$0xff]  ;;  %v425_v60 = vmax.f32 %v355_v58, 0.0 }
  0xcb   : > { %859 = vrot.lane.b32.xlu0 %v791_v31, %s2701_s13  ;;  %1082 = vrot.lane.b32.xlu2 %v999_v8, %s2703_s17  ;;  %521 = vst.msk [vmem:[#allocation2 + $0x129] sm:$0xff] %vm451_vm2, %v442_v30  ;;  %v2982_v36 = vld [vmem:[#allocation2 + $0x50] sm:$0xff]  ;;  %v3016_v59 = vld [vmem:[#allocation2 + $0x121] sm:$0xff] }
  0xcc   : > { %1239 = vrot.lane.b32.xlu1 %v597_v16, %s2702_s16  ;;  %569 = vst.msk [vmem:[#allocation3 + $0x38] sm:$0xff] %vm451_vm2, %v2982_v36  ;;  %v794_v9 = vld [vmem:[#allocation2 + $0x52] sm:$0xff]  ;;  %v3054_v20 = vld [vmem:[#allocation2 + $0x4a] sm:$0xff] }
  0xcd   : > { %586 = vst.msk [vmem:[#allocation3 + $0xc0] sm:$0xff] %vm451_vm2, %v1002_v44  ;;  %v1178_v29 = vld [vmem:[#allocation2 + $0x51] sm:$0xff] }
  0xce   : > { %504 = vst.msk [vmem:[#allocation2 + $0x61] sm:$0xff] %vm451_vm2, %v425_v60  ;;  %v399_v63 = vpop.f32.mrf.mxu3 }
  0xcf   : > { %v356_v2 = vpop.f32.mrf.mxu0  ;;  %v400_v3 = vadd.f32 %v2916_v37, %v399_v63 }
  0xd0   : > { %v357_v5 = vadd.f32 %v2916_v37, %v356_v2 }
  0xd1   : > { %v443_v7 = vmax.f32 %v400_v3, 0.0 }
  0xd2   : > { %v2995_v45 = vld [vmem:[#allocation2 + $0x128] sm:$0xff]  ;;  %v426_v8 = vmax.f32 %v357_v5, 0.0 }
  0xd3   : > { %1243 = vrot.lane.b32.xlu0 %v1176_v39, %s2702_s16  ;;  %666 = vrot.lane.b32.xlu2 %v598_v38, %s2700_s12  ;;  %587 = vst.msk [vmem:[#allocation3 + $0xc8] sm:$0xff] %vm451_vm2, %v2995_v45  ;;  %v812_v19 = vld [vmem:[#allocation2 + $0x12a] sm:$0xff] }
  0xd4   : > { %891 = vrot.lane.b32.xlu1 %v807_v42, %s2701_s13  ;;  %522 = vst.msk [vmem:[#allocation2 + $0x139] sm:$0xff] %vm451_vm2, %v443_v7 }
  0xd5   : > { %505 = vst.msk [vmem:[#allocation2 + $0x69] sm:$0xff] %vm451_vm2, %v426_v8  ;;  %v986_v14 = vld [vmem:[#allocation2 + $0x60] sm:$0xff] }
  0xd6   : > { %v401_v11 = vpop.f32.mrf.mxu3  ;;  %570 = vst.msk [vmem:[#allocation3 + $0x40] sm:$0xff] %vm451_vm2, %v986_v14  ;;  %v1179_v33 = vld [vmem:[#allocation2 + $0x61] sm:$0xff] }
  0xd7   : > { %v402_v12 = vadd.f32 %v2916_v37, %v401_v11  ;;  %v359_v16 = vpop.f32.mrf.mxu0 }
  0xd9   : > { %v444_v13 = vmax.f32 %v402_v12, 0.0 }
  0xdb   : > { %895 = vrot.lane.b32.xlu0 %v809_v46, %s2701_s13  ;;  %1241 = vrot.lane.b32.xlu2 %v598_v38, %s2702_s16  ;;  %523 = vst.msk [vmem:[#allocation2 + $0x141] sm:$0xff] %vm451_vm2, %v444_v13  ;;  %v1004_v21 = vld [vmem:[#allocation2 + $0x138] sm:$0xff] }
  0xdc   : > { %702 = vrot.lane.b32.xlu1 %v3002_v47, %s2700_s12  ;;  %v3048_v15 = vld [vmem:[#allocation2 + $0x68] sm:$0xff]  ;;  %588 = vst.msk [vmem:[#allocation3 + $0xd0] sm:$0xff] %vm451_vm2, %v1004_v21  ;;  %v3099_v51 = vld [vmem:[#allocation2 + $0x139] sm:$0xff] }
  0xdd   : > { %571 = vst.msk [vmem:[#allocation3 + $0x48] sm:$0xff] %vm451_vm2, %v3048_v15  ;;  %v3116_v58 = vld [vmem:[#allocation2 + $0x6a] sm:$0xff]  ;;  %v3121_v60 = vld [vmem:[#allocation2 + $0x62] sm:$0xff] }
  0xde   : > { %v404_v24 = vpop.f32.mrf.mxu3 }
  0xdf   : > { %v405_v25 = vadd.f32 %v2916_v37, %v404_v24  ;;  %v361_v26 = vpop.f32.mrf.mxu0 }
  0xe1   : > { %v445_v28 = vmax.f32 %v405_v25, 0.0 }
  0xe2   : > { %v3061_v23 = vld [vmem:[#allocation2 + $0x140] sm:$0xff] }
  0xe3   : > { %670 = vrot.lane.b32.xlu0 %v600_v53, %s2700_s12  ;;  %668 = vrot.lane.b32.xlu2 %v1176_v39, %s2700_s12  ;;  %589 = vst.msk [vmem:[#allocation3 + $0xd8] sm:$0xff] %vm451_vm2, %v3061_v23  ;;  %v3079_v39 = vld [vmem:[#allocation2 + $0x129] sm:$0xff]  ;;  %v3097_v50 = vld [vmem:[#allocation2 + $0x141] sm:$0xff] }
  0xe4   : > { %861 = vrot.lane.b32.xlu1 %v792_v54, %s2701_s13  ;;  %524 = vst.msk [vmem:[#allocation2 + $0x151] sm:$0xff] %vm451_vm2, %v445_v28  ;;  %v3143_v13 = vld [vmem:[#allocation2 + $0x142] sm:$0xff] }
  0xe6   : > { %v406_v34 = vpop.f32.mrf.mxu3 }
  0xe7   : > { %v364_v55 = vpop.f32.mrf.mxu0 }
  0xe8   : > { %v365_v56 = vadd.f32 %v2916_v37, %v364_v55 }
  0xea   : > { %v429_v57 = vmax.f32 %v365_v56, 0.0 }
  0xeb   : > { %706 = vrot.lane.b32.xlu0 %v3016_v59, %s2700_s12  ;;  %704 = vrot.lane.b32.xlu2 %v3019_v61, %s2700_s12  ;;  %v1006_v38 = vld [vmem:[#allocation2 + $0x150] sm:$0xff] }
  0xec   : > { %1050 = vrot.lane.b32.xlu1 %v2957_v17, %s2703_s17  ;;  %v360_v17 = vadd.f32 %v2916_v37, %v359_v16  ;;  %590 = vst.msk [vmem:[#allocation3 + $0xe0] sm:$0xff] %vm451_vm2, %v1006_v38 }
  0xed   : > { %508 = vst.msk [vmem:[#allocation2 + $0x91] sm:$0xff] %vm451_vm2, %v429_v57 }
  0xee   : > { %v427_v18 = vmax.f32 %v360_v17, 0.0  ;;  %v409_v1 = vpop.f32.mrf.mxu3 }
  0xef   : > { %v410_v2 = vadd.f32 %v2916_v37, %v409_v1  ;;  %v366_v3 = vpop.f32.mrf.mxu0 }
  0xf0   : > { %506 = vst.msk [vmem:[#allocation2 + $0x79] sm:$0xff] %vm451_vm2, %v427_v18  ;;  %v367_v5 = vadd.f32 %v2916_v37, %v366_v3 }
  0xf1   : > { %v447_v4 = vmax.f32 %v410_v2, 0.0 }
  0xf2   : > { %v430_v6 = vmax.f32 %v367_v5, 0.0 }
  0xf3   : > { %865 = vrot.lane.b32.xlu0 %v794_v9, %s2701_s13  ;;  %1052 = vrot.lane.b32.xlu2 %v2980_v35, %s2703_s17  ;;  %v407_v35 = vadd.f32 %v2916_v37, %v406_v34  ;;  %526 = vst.msk [vmem:[#allocation2 + $0x169] sm:$0xff] %vm451_vm2, %v447_v4 }
  0xf4   : > { %897 = vrot.lane.b32.xlu1 %v810_v10, %s2701_s13  ;;  %509 = vst.msk [vmem:[#allocation2 + $0x99] sm:$0xff] %vm451_vm2, %v430_v6  ;;  %v3189_v34 = vld [vmem:[#allocation2 + $0x91] sm:$0xff] }
  0xf5   : > { %v446_v40 = vmax.f32 %v407_v35, 0.0 }
  0xf6   : > { %v411_v10 = vpop.f32.mrf.mxu3 }
  0xf7   : > { %v988_v31 = vld [vmem:[#allocation2 + $0x78] sm:$0xff]  ;;  %525 = vst.msk [vmem:[#allocation2 + $0x159] sm:$0xff] %vm451_vm2, %v446_v40  ;;  %v412_v11 = vadd.f32 %v2916_v37, %v411_v10  ;;  %v369_v35 = vpop.f32.mrf.mxu0 }
  0xf8   : > { %572 = vst.msk [vmem:[#allocation3 + $0x50] sm:$0xff] %vm451_vm2, %v988_v31  ;;  %v604_v24 = vld [vmem:[#allocation2 + $0x79] sm:$0xff] }
  0xfa   : > { %v3170_v28 = vld [vmem:[#allocation2 + $0x168] sm:$0xff] }
  0xfb   : > { %1054 = vrot.lane.b32.xlu0 %v2982_v36, %s2703_s17  ;;  %1088 = vrot.lane.b32.xlu2 %v1002_v44, %s2703_s17  ;;  %v811_v36 = vld [vmem:[#allocation2 + $0x122] sm:$0xff]  ;;  %592 = vst.msk [vmem:[#allocation3 + $0xf0] sm:$0xff] %vm451_vm2, %v3170_v28  ;;  %v3221_v5 = vld [vmem:[#allocation2 + $0x9a] sm:$0xff] }
  0xfc   : > { %1086 = vrot.lane.b32.xlu1 %v2967_v27, %s2703_s17  ;;  %v362_v27 = vadd.f32 %v2916_v37, %v361_v26  ;;  %v603_v44 = vld [vmem:[#allocation2 + $0x69] sm:$0xff] }
  0xfe   : > { %v428_v30 = vmax.f32 %v362_v27, 0.0  ;;  %v3095_v49 = vld [vmem:[#allocation2 + $0x158] sm:$0xff] }
  0xff   : > { %591 = vst.msk [vmem:[#allocation3 + $0xe8] sm:$0xff] %vm451_vm2, %v3095_v49  ;;  %v3206_v55 = vld [vmem:[#allocation2 + $0x159] sm:$0xff] }
 0x100   : > { %507 = vst.msk [vmem:[#allocation2 + $0x81] sm:$0xff] %vm451_vm2, %v428_v30  ;;  %v3182_v30 = vld [vmem:[#allocation2 + $0x151] sm:$0xff]  ;;  %v816_v6 = vld [vmem:[#allocation2 + $0x15a] sm:$0xff] }
 0x103   : > { %901 = vrot.lane.b32.xlu0 %v812_v19, %s2701_s13  ;;  %863 = vrot.lane.b32.xlu2 %v3054_v20, %s2701_s13  ;;  %v3155_v19 = vld [vmem:[#allocation2 + $0x90] sm:$0xff] }
 0x104   : > { %1245 = vrot.lane.b32.xlu1 %v600_v53, %s2702_s16  ;;  %574 = vst.msk [vmem:[#allocation3 + $0x60] sm:$0xff] %vm451_vm2, %v3155_v19 }
 0x105   : > { %v699_v22 = vpop.permute.xlu2 %698 }
 0x106   : > { %775 = vst.msk [vmem:[#allocation3 + $0xa0] sm:$0xff] %vm754_vm5, %v699_v22 }
 0x107   : > { %v3087_v43 = vld [vmem:[#allocation2 + $0x80] sm:$0xff] }
 0x108   : > { %573 = vst.msk [vmem:[#allocation3 + $0x58] sm:$0xff] %vm451_vm2, %v3087_v43  ;;  %v3141_v12 = vld [vmem:[#allocation2 + $0x7a] sm:$0xff] }
 0x109   : > { %v1182_v22 = vld [vmem:[#allocation2 + $0x81] sm:$0xff] }
 0x10b   : > { %1090 = vrot.lane.b32.xlu0 %v2995_v45, %s2703_s17  ;;  %1247 = vrot.lane.b32.xlu2 %v1178_v29, %s2702_s16 }
 0x10c   : > { %672 = vrot.lane.b32.xlu1 %v1178_v29, %s2700_s12 }
 0x10d   : > { %v858_v32 = vpop.permute.xlu2 %857 }
 0x113   : > { %1249 = vrot.lane.b32.xlu0 %v1179_v33, %s2702_s16  ;;  %899 = vrot.lane.b32.xlu2 %v811_v36, %s2701_s13  ;;  %v370_v36 = vadd.f32 %v2916_v37, %v369_v35 }
 0x114   : > { %708 = vrot.lane.b32.xlu1 %v3079_v39, %s2700_s12 }
 0x115   : > { %v1047_v41 = vpop.permute.xlu2 %1046  ;;  %v431_v40 = vmax.f32 %v370_v36, 0.0 }
 0x116   : > { %1142 = vst.msk [vmem:[#allocation3 + $0x8] sm:$0xff] %vm1140_vm7, %v1047_v41  ;;  %v663_v42 = vpop.permute.xlu1 %662  ;;  %v1238_v45 = vpop.permute.xlu0 %1237 }
 0x117   : > { %757 = vst.msk [vmem:[#allocation3 + $0x10] sm:$0xff] %vm754_vm5, %v663_v42 }
 0x118   : > { %510 = vst.msk [vmem:[#allocation2 + $0xa9] sm:$0xff] %vm451_vm2, %v431_v40 }
 0x11b   : > { %676 = vrot.lane.b32.xlu0 %v603_v44, %s2700_s12  ;;  %674 = vrot.lane.b32.xlu2 %v1179_v33, %s2700_s12 }
 0x11c   : > { %1056 = vrot.lane.b32.xlu1 %v986_v14, %s2703_s17  ;;  %v3149_v14 = vld [vmem:[#allocation2 + $0x13a] sm:$0xff] }
 0x11d   : > { %v894_v46 = vpop.permute.xlu2 %893 }
 0x11e   : > { %v1045_v48 = vpop.permute.xlu1 %1044 }
 0x11f   : > { %1141 = vst.msk [vmem:[#allocation3] sm:$0xff] %vm1140_vm7, %v1045_v48 }
 0x120   : > { %1334 = vst.msk [vmem:[#allocation3] sm:$0xff] %vm1333_vm8, %v1238_v45  ;;  %v3203_v45 = vld [vmem:[#allocation2 + $0x169] sm:$0xff] }
 0x123   : > { %712 = vrot.lane.b32.xlu0 %v3097_v50, %s2700_s12  ;;  %710 = vrot.lane.b32.xlu2 %v3099_v51, %s2700_s12 }
 0x124   : > { %1092 = vrot.lane.b32.xlu1 %v1004_v21, %s2703_s17  ;;  %v3158_v21 = vld [vmem:[#allocation2 + $0x98] sm:$0xff] }
 0x125   : > { %v701_v52 = vpop.permute.xlu0 %700  ;;  %v3109_v53 = vpop.permute.xlu2 %1082  ;;  %575 = vst.msk [vmem:[#allocation3 + $0x68] sm:$0xff] %vm451_vm2, %v3158_v21 }
 0x126   : > { %776 = vst.msk [vmem:[#allocation3 + $0xa8] sm:$0xff] %vm754_vm5, %v701_v52  ;;  %v3112_v54 = vpop.permute.xlu1 %1080  ;;  %v414_v48 = vpop.f32.mrf.mxu3 }
 0x127   : > { %969 = vst.msk [vmem:[#allocation3 + $0xa8] sm:$0xff] %vm947_vm6, %v894_v46  ;;  %v371_v46 = vpop.f32.mrf.mxu0  ;;  %v415_v56 = vadd.f32 %v2916_v37, %v414_v48 }
 0x128   : > { %v372_v52 = vadd.f32 %v2916_v37, %v371_v46 }
 0x129   : > { %v449_v1 = vmax.f32 %v415_v56, 0.0  ;;  %v3282_v56 = vld [vmem:[#allocation2 + $0xa9] sm:$0xff] }
 0x12a   : > { %v432_v57 = vmax.f32 %v372_v52, 0.0 }
 0x12b   : > { %1060 = vrot.lane.b32.xlu0 %v988_v31, %s2703_s17  ;;  %869 = vrot.lane.b32.xlu2 %v3116_v58, %s2701_s13  ;;  %528 = vst.msk [vmem:[#allocation2 + $0x181] sm:$0xff] %vm451_vm2, %v449_v1 }
 0x12c   : > { %867 = vrot.lane.b32.xlu1 %v3121_v60, %s2701_s13  ;;  %511 = vst.msk [vmem:[#allocation2 + $0xb1] sm:$0xff] %vm451_vm2, %v432_v57 }
 0x12d   : > { %v1049_v62 = vpop.permute.xlu0 %1048  ;;  %v667_v63 = vpop.permute.xlu2 %666 }
 0x12e   : > { %759 = vst.msk [vmem:[#allocation3 + $0x20] sm:$0xff] %vm754_vm5, %v667_v63  ;;  %v665_v0 = vpop.permute.xlu1 %664  ;;  %v416_v4 = vpop.f32.mrf.mxu3 }
 0x12f   : > { %758 = vst.msk [vmem:[#allocation3 + $0x18] sm:$0xff] %vm754_vm5, %v665_v0  ;;  %v374_v2 = vpop.f32.mrf.mxu0 }
 0x130   : > { %951 = vst.msk [vmem:[#allocation3 + $0x18] sm:$0xff] %vm947_vm6, %v858_v32  ;;  %v375_v3 = vadd.f32 %v2916_v37, %v374_v2 }
 0x132   : > { %v1010_v2 = vld [vmem:[#allocation2 + $0x180] sm:$0xff] }
 0x133   : > { %1096 = vrot.lane.b32.xlu0 %v1006_v38, %s2703_s17  ;;  %1058 = vrot.lane.b32.xlu2 %v3048_v15, %s2703_s17  ;;  %v448_v15 = vmax.f32 %v412_v11, 0.0  ;;  %v3195_v38 = vld [vmem:[#allocation2 + $0x82] sm:$0xff] }
 0x134   : > { %1251 = vrot.lane.b32.xlu1 %v603_v44, %s2702_s16  ;;  %v992_v11 = vld [vmem:[#allocation2 + $0xa8] sm:$0xff] }
 0x135   : > { %v1085_v7 = vpop.permute.xlu0 %1084  ;;  %v1242_v8 = vpop.permute.xlu2 %1241  ;;  %527 = vst.msk [vmem:[#allocation2 + $0x171] sm:$0xff] %vm451_vm2, %v448_v15 }
 0x136   : > { %v856_v9 = vpop.permute.xlu1 %855  ;;  %576 = vst.msk [vmem:[#allocation3 + $0x70] sm:$0xff] %vm451_vm2, %v992_v11 }
 0x137   : > { %950 = vst.msk [vmem:[#allocation3 + $0x10] sm:$0xff] %vm947_vm6, %v856_v9 }
 0x138   : > { %1143 = vst.msk [vmem:[#allocation3 + $0x10] sm:$0xff] %vm1140_vm7, %v1049_v62 }
 0x139   : > { %1336 = vst.msk [vmem:[#allocation3 + $0x10] sm:$0xff] %vm1333_vm8, %v1242_v8 }
 0x13b   : > { %871 = vrot.lane.b32.xlu0 %v3141_v12, %s2701_s13  ;;  %905 = vrot.lane.b32.xlu2 %v3143_v13, %s2701_s13 }
 0x13c   : > { %903 = vrot.lane.b32.xlu1 %v3149_v14, %s2701_s13  ;;  %v3173_v29 = vld [vmem:[#allocation2 + $0x170] sm:$0xff] }
 0x13d   : > { %v860_v16 = vpop.permute.xlu0 %859  ;;  %v669_v17 = vpop.permute.xlu2 %668  ;;  %593 = vst.msk [vmem:[#allocation3 + $0xf8] sm:$0xff] %vm451_vm2, %v3173_v29 }
 0x13e   : > { %952 = vst.msk [vmem:[#allocation3 + $0x20] sm:$0xff] %vm947_vm6, %v860_v16  ;;  %v1240_v18 = vpop.permute.xlu1 %1239  ;;  %v3232_v16 = vld [vmem:[#allocation2 + $0xb0] sm:$0xff] }
 0x13f   : > { %760 = vst.msk [vmem:[#allocation3 + $0x28] sm:$0xff] %vm754_vm5, %v669_v17  ;;  %v376_v17 = vpop.f32.mrf.mxu0 }
 0x140   : > { %1335 = vst.msk [vmem:[#allocation3 + $0x8] sm:$0xff] %vm1333_vm8, %v1240_v18  ;;  %v377_v18 = vadd.f32 %v2916_v37, %v376_v17 }
 0x141   : > { %577 = vst.msk [vmem:[#allocation3 + $0x78] sm:$0xff] %vm451_vm2, %v3232_v16 }
 0x143   : > { %1255 = vrot.lane.b32.xlu0 %v1182_v22, %s2702_s16  ;;  %1094 = vrot.lane.b32.xlu2 %v3061_v23, %s2703_s17  ;;  %v815_v23 = vld [vmem:[#allocation2 + $0x152] sm:$0xff] }
 0x144   : > { %678 = vrot.lane.b32.xlu1 %v604_v24, %s2700_s12 }
 0x145   : > { %v1244_v25 = vpop.permute.xlu0 %1243  ;;  %v705_v26 = vpop.permute.xlu2 %704 }
 0x146   : > { %778 = vst.msk [vmem:[#allocation3 + $0xb8] sm:$0xff] %vm754_vm5, %v705_v26  ;;  %v892_v27 = vpop.permute.xlu1 %891 }
 0x147   : > { %968 = vst.msk [vmem:[#allocation3 + $0xa0] sm:$0xff] %vm947_vm6, %v892_v27  ;;  %v379_v26 = vpop.f32.mrf.mxu0 }
 0x148   : > { %1161 = vst.msk [vmem:[#allocation3 + $0xa0] sm:$0xff] %vm1140_vm7, %v1085_v7  ;;  %v433_v7 = vmax.f32 %v375_v3, 0.0  ;;  %v380_v27 = vadd.f32 %v2916_v37, %v379_v26  ;;  %v3293_v3 = vld [vmem:[#allocation2 + $0xb2] sm:$0xff] }
 0x14a   : > { %512 = vst.msk [vmem:[#allocation2 + $0xc1] sm:$0xff] %vm451_vm2, %v433_v7 }
 0x14b   : > { %907 = vrot.lane.b32.xlu0 %v815_v23, %s2701_s13  ;;  %1253 = vrot.lane.b32.xlu2 %v604_v24, %s2702_s16  ;;  %v3251_v23 = vld [vmem:[#allocation2 + $0x92] sm:$0xff] }
 0x14c   : > { %714 = vrot.lane.b32.xlu1 %v3182_v30, %s2700_s12 }
 0x14d   : > { %v896_v31 = vpop.permute.xlu0 %895  ;;  %v1053_v32 = vpop.permute.xlu2 %1052 }
 0x14e   : > { %1145 = vst.msk [vmem:[#allocation3 + $0x20] sm:$0xff] %vm1140_vm7, %v1053_v32  ;;  %v703_v33 = vpop.permute.xlu1 %702 }
 0x14f   : > { %777 = vst.msk [vmem:[#allocation3 + $0xb0] sm:$0xff] %vm754_vm5, %v703_v33  ;;  %v381_v36 = vpop.f32.mrf.mxu0 }
 0x150   : > { %970 = vst.msk [vmem:[#allocation3 + $0xb0] sm:$0xff] %vm947_vm6, %v896_v31  ;;  %v435_v31 = vmax.f32 %v380_v27, 0.0 }
 0x152   : > { %514 = vst.msk [vmem:[#allocation2 + $0xd9] sm:$0xff] %vm451_vm2, %v435_v31 }
 0x153   : > { %682 = vrot.lane.b32.xlu0 %v3189_v34, %s2700_s12  ;;  %680 = vrot.lane.b32.xlu2 %v1182_v22, %s2700_s12 }
 0x154   : > { %873 = vrot.lane.b32.xlu1 %v3195_v38, %s2701_s13 }
 0x155   : > { %v671_v41 = vpop.permute.xlu0 %670  ;;  %v1089_v42 = vpop.permute.xlu2 %1088 }
 0x156   : > { %761 = vst.msk [vmem:[#allocation3 + $0x30] sm:$0xff] %vm754_vm5, %v671_v41  ;;  %v862_v44 = vpop.permute.xlu1 %861  ;;  %v382_v41 = vadd.f32 %v2916_v37, %v381_v36 }
 0x157   : > { %1163 = vst.msk [vmem:[#allocation3 + $0xb0] sm:$0xff] %vm1140_vm7, %v1089_v42  ;;  %v817_v42 = vld [vmem:[#allocation2 + $0x16a] sm:$0xff] }
 0x158   : > { %953 = vst.msk [vmem:[#allocation3 + $0x28] sm:$0xff] %vm947_vm6, %v862_v44  ;;  %v3272_v44 = vld [vmem:[#allocation2 + $0x171] sm:$0xff]  ;;  %v436_v46 = vmax.f32 %v382_v41, 0.0 }
 0x159   : > { %v996_v1 = vld [vmem:[#allocation2 + $0xd8] sm:$0xff] }
 0x15a   : > { %515 = vst.msk [vmem:[#allocation2 + $0xe1] sm:$0xff] %vm451_vm2, %v436_v46 }
 0x15b   : > { %718 = vrot.lane.b32.xlu0 %v3203_v45, %s2700_s12  ;;  %716 = vrot.lane.b32.xlu2 %v3206_v55, %s2700_s12  ;;  %580 = vst.msk [vmem:[#allocation3 + $0x90] sm:$0xff] %vm451_vm2, %v996_v1 }
 0x15c   : > { %1062 = vrot.lane.b32.xlu1 %v3087_v43, %s2703_s17  ;;  %v417_v43 = vadd.f32 %v2916_v37, %v416_v4 }
 0x15d   : > { %v707_v62 = vpop.permute.xlu0 %706  ;;  %v864_v63 = vpop.permute.xlu2 %863 }
 0x15e   : > { %779 = vst.msk [vmem:[#allocation3 + $0xc0] sm:$0xff] %vm754_vm5, %v707_v62  ;;  %v1051_v0 = vpop.permute.xlu1 %1050  ;;  %v450_v8 = vmax.f32 %v417_v43, 0.0 }
 0x15f   : > { %954 = vst.msk [vmem:[#allocation3 + $0x30] sm:$0xff] %vm947_vm6, %v864_v63 }
 0x160   : > { %1144 = vst.msk [vmem:[#allocation3 + $0x18] sm:$0xff] %vm1140_vm7, %v1051_v0 }
 0x161   : > { %1337 = vst.msk [vmem:[#allocation3 + $0x18] sm:$0xff] %vm1333_vm8, %v1244_v25  ;;  %v997_v0 = vld [vmem:[#allocation2 + $0xe0] sm:$0xff] }
 0x162   : > { %529 = vst.msk [vmem:[#allocation2 + $0x189] sm:$0xff] %vm451_vm2, %v450_v8  ;;  %v3311_v8 = vld [vmem:[#allocation2 + $0xaa] sm:$0xff]  ;;  %v613_v41 = vld [vmem:[#allocation2 + $0xe1] sm:$0xff] }
 0x163   : > { %877 = vrot.lane.b32.xlu0 %v3221_v5, %s2701_s13  ;;  %1064 = vrot.lane.b32.xlu2 %v3155_v19, %s2703_s17  ;;  %v434_v19 = vmax.f32 %v377_v18, 0.0  ;;  %581 = vst.msk [vmem:[#allocation3 + $0x98] sm:$0xff] %vm451_vm2, %v997_v0 }
 0x164   : > { %909 = vrot.lane.b32.xlu1 %v816_v6, %s2701_s13 }
 0x165   : > { %v866_v9 = vpop.permute.xlu0 %865  ;;  %v1248_v10 = vpop.permute.xlu2 %1247  ;;  %513 = vst.msk [vmem:[#allocation2 + $0xc9] sm:$0xff] %vm451_vm2, %v434_v19 }
 0x166   : > { %v898_v15 = vpop.permute.xlu1 %897 }
 0x167   : > { %971 = vst.msk [vmem:[#allocation3 + $0xb8] sm:$0xff] %vm947_vm6, %v898_v15  ;;  %v3318_v15 = vld [vmem:[#allocation2 + $0xd9] sm:$0xff] }
 0x169   : > { %v1011_v17 = vld [vmem:[#allocation2 + $0x188] sm:$0xff] }
 0x16b   : > { %1066 = vrot.lane.b32.xlu0 %v3158_v21, %s2703_s17  ;;  %1100 = vrot.lane.b32.xlu2 %v3170_v28, %s2703_s17  ;;  %v994_v21 = vld [vmem:[#allocation2 + $0xc0] sm:$0xff]  ;;  %v818_v28 = vld [vmem:[#allocation2 + $0x172] sm:$0xff] }
 0x16c   : > { %1098 = vrot.lane.b32.xlu1 %v3095_v49, %s2703_s17  ;;  %578 = vst.msk [vmem:[#allocation3 + $0x80] sm:$0xff] %vm451_vm2, %v994_v21  ;;  %v3257_v49 = vld [vmem:[#allocation2 + $0x99] sm:$0xff]  ;;  %v3264_v40 = vld [vmem:[#allocation2 + $0xc8] sm:$0xff] }
 0x16d   : > { %v1055_v22 = vpop.permute.xlu0 %1054  ;;  %v900_v24 = vpop.permute.xlu2 %899  ;;  %579 = vst.msk [vmem:[#allocation3 + $0x88] sm:$0xff] %vm451_vm2, %v3264_v40  ;;  %v3303_v7 = vld [vmem:[#allocation2 + $0xc2] sm:$0xff]  ;;  %v3332_v26 = vld [vmem:[#allocation2 + $0xca] sm:$0xff] }
 0x16e   : > { %1146 = vst.msk [vmem:[#allocation3 + $0x28] sm:$0xff] %vm1140_vm7, %v1055_v22  ;;  %v1087_v25 = vpop.permute.xlu1 %1086 }
 0x16f   : > { %1339 = vst.msk [vmem:[#allocation3 + $0x28] sm:$0xff] %vm1333_vm8, %v1248_v10 }
 0x170   : > { %972 = vst.msk [vmem:[#allocation3 + $0xc0] sm:$0xff] %vm947_vm6, %v900_v24  ;;  %v3327_v24 = vld [vmem:[#allocation2 + $0xe2] sm:$0xff] }
 0x171   : > { %1162 = vst.msk [vmem:[#allocation3 + $0xa8] sm:$0xff] %vm1140_vm7, %v1087_v25  ;;  %v611_v25 = vld [vmem:[#allocation2 + $0xc9] sm:$0xff] }
 0x173   : > { %913 = vrot.lane.b32.xlu0 %v818_v28, %s2701_s13  ;;  %875 = vrot.lane.b32.xlu2 %v3251_v23, %s2701_s13 }
 0x174   : > { %684 = vrot.lane.b32.xlu1 %v3257_v49, %s2700_s12 }
 0x175   : > { %v902_v32 = vpop.permute.xlu0 %901  ;;  %v675_v33 = vpop.permute.xlu2 %674 }
 0x176   : > { %763 = vst.msk [vmem:[#allocation3 + $0x40] sm:$0xff] %vm754_vm5, %v675_v33  ;;  %v1246_v35 = vpop.permute.xlu1 %1245 }
 0x177   : > { %1338 = vst.msk [vmem:[#allocation3 + $0x20] sm:$0xff] %vm1333_vm8, %v1246_v35 }
 0x17b   : > { %1102 = vrot.lane.b32.xlu0 %v3173_v29, %s2703_s17  ;;  %911 = vrot.lane.b32.xlu2 %v817_v42, %s2701_s13  ;;  %v3280_v29 = vld [vmem:[#allocation2 + $0xb1] sm:$0xff] }
 0x17c   : > { %720 = vrot.lane.b32.xlu1 %v3272_v44, %s2700_s12 }
 0x17d   : > { %v1091_v48 = vpop.permute.xlu0 %1090  ;;  %v711_v52 = vpop.permute.xlu2 %710 }
 0x17e   : > { %1164 = vst.msk [vmem:[#allocation3 + $0xb8] sm:$0xff] %vm1140_vm7, %v1091_v48  ;;  %v673_v37 = vpop.permute.xlu1 %672  ;;  %v3363_v48 = vld [vmem:[#allocation2 + $0xf1] sm:$0xff] }
 0x17f   : > { %781 = vst.msk [vmem:[#allocation3 + $0xd0] sm:$0xff] %vm754_vm5, %v711_v52 }
 0x180   : > { %762 = vst.msk [vmem:[#allocation3 + $0x38] sm:$0xff] %vm754_vm5, %v673_v37 }
 0x181   : > { %955 = vst.msk [vmem:[#allocation3 + $0x38] sm:$0xff] %vm947_vm6, %v866_v9 }
 0x183   : > { %688 = vrot.lane.b32.xlu0 %v3280_v29, %s2700_s12  ;;  %686 = vrot.lane.b32.xlu2 %v3282_v56, %s2700_s12 }
 0x184   : > { %1068 = vrot.lane.b32.xlu1 %v992_v11, %s2703_s17 }
 0x185   : > { %v1250_v57 = vpop.permute.xlu0 %1249  ;;  %v870_v62 = vpop.permute.xlu2 %869 }
 0x186   : > { %v709_v63 = vpop.permute.xlu1 %708 }
 0x187   : > { %780 = vst.msk [vmem:[#allocation3 + $0xc8] sm:$0xff] %vm754_vm5, %v709_v63 }
 0x188   : > { %973 = vst.msk [vmem:[#allocation3 + $0xc8] sm:$0xff] %vm947_vm6, %v902_v32 }
 0x18b   : > { %1072 = vrot.lane.b32.xlu0 %v994_v21, %s2703_s17  ;;  %881 = vrot.lane.b32.xlu2 %v3293_v3, %s2701_s13 }
 0x18c   : > { %1104 = vrot.lane.b32.xlu1 %v1010_v2, %s2703_s17 }
 0x18d   : > { %v677_v4 = vpop.permute.xlu0 %676  ;;  %v1059_v43 = vpop.permute.xlu2 %1058 }
 0x18e   : > { %764 = vst.msk [vmem:[#allocation3 + $0x48] sm:$0xff] %vm754_vm5, %v677_v4  ;;  %v1057_v6 = vpop.permute.xlu1 %1056  ;;  %v1203_v4 = vld [vmem:[#allocation2 + $0x181] sm:$0xff] }
 0x18f   : > { %957 = vst.msk [vmem:[#allocation3 + $0x48] sm:$0xff] %vm947_vm6, %v870_v62 }
 0x190   : > { %1148 = vst.msk [vmem:[#allocation3 + $0x38] sm:$0xff] %vm1140_vm7, %v1059_v43  ;;  %v1367_v43 = vld [vmem:[#allocation2 + $0x22] sm:$0xff] }
 0x191   : > { %1147 = vst.msk [vmem:[#allocation3 + $0x30] sm:$0xff] %vm1140_vm7, %v1057_v6 }
 0x192   : > { %1340 = vst.msk [vmem:[#allocation3 + $0x30] sm:$0xff] %vm1333_vm8, %v1250_v57 }
 0x193   : > { %883 = vrot.lane.b32.xlu0 %v3303_v7, %s2701_s13  ;;  %1070 = vrot.lane.b32.xlu2 %v3232_v16, %s2703_s17  ;;  %v610_v16 = vld [vmem:[#allocation2 + $0xc1] sm:$0xff] }
 0x194   : > { %879 = vrot.lane.b32.xlu1 %v3311_v8, %s2701_s13 }
 0x195   : > { %v713_v9 = vpop.permute.xlu0 %712  ;;  %v906_v10 = vpop.permute.xlu2 %905 }
 0x196   : > { %782 = vst.msk [vmem:[#allocation3 + $0xd8] sm:$0xff] %vm754_vm5, %v713_v9  ;;  %v1093_v11 = vpop.permute.xlu1 %1092  ;;  %v1366_v9 = vld [vmem:[#allocation2 + $0x1a] sm:$0xff] }
 0x197   : > { %975 = vst.msk [vmem:[#allocation3 + $0xd8] sm:$0xff] %vm947_vm6, %v906_v10 }
 0x198   : > { %1165 = vst.msk [vmem:[#allocation3 + $0xc0] sm:$0xff] %vm1140_vm7, %v1093_v11 }
 0x19b   : > { %694 = vrot.lane.b32.xlu0 %v3318_v15, %s2700_s12  ;;  %1106 = vrot.lane.b32.xlu2 %v1011_v17, %s2703_s17 }
 0x19c   : > { %690 = vrot.lane.b32.xlu1 %v610_v16, %s2700_s12 }
 0x19d   : > { %v1061_v18 = vpop.permute.xlu0 %1060  ;;  %v1095_v19 = vpop.permute.xlu2 %1094 }
 0x19e   : > { %1166 = vst.msk [vmem:[#allocation3 + $0xc8] sm:$0xff] %vm1140_vm7, %v1095_v19  ;;  %v868_v22 = vpop.permute.xlu1 %867 }
 0x19f   : > { %956 = vst.msk [vmem:[#allocation3 + $0x40] sm:$0xff] %vm947_vm6, %v868_v22 }
 0x1a0   : > { %1149 = vst.msk [vmem:[#allocation3 + $0x40] sm:$0xff] %vm1140_vm7, %v1061_v18 }
 0x1a3   : > { %889 = vrot.lane.b32.xlu0 %v3327_v24, %s2701_s13  ;;  %692 = vrot.lane.b32.xlu2 %v611_v25, %s2700_s12 }
 0x1a4   : > { %885 = vrot.lane.b32.xlu1 %v3332_v26, %s2701_s13 }
 0x1a5   : > { %v1097_v21 = vpop.permute.xlu0 %1096  ;;  %v1254_v27 = vpop.permute.xlu2 %1253 }
 0x1a6   : > { %1342 = vst.msk [vmem:[#allocation3 + $0x40] sm:$0xff] %vm1333_vm8, %v1254_v27  ;;  %v1252_v28 = vpop.permute.xlu1 %1251  ;;  %v1385_v27 = vld [vmem:[#allocation2 + $0xfa] sm:$0xff] }
 0x1a7   : > { %1341 = vst.msk [vmem:[#allocation3 + $0x38] sm:$0xff] %vm1333_vm8, %v1252_v28 }
 0x1ab   : > { %1078 = vrot.lane.b32.xlu0 %v997_v0, %s2703_s17  ;;  %1259 = vrot.lane.b32.xlu2 %v3257_v49, %s2702_s16 }
 0x1ac   : > { %1074 = vrot.lane.b32.xlu1 %v3264_v40, %s2703_s17  ;;  %v3354_v40 = vld [vmem:[#allocation2 + $0xda] sm:$0xff] }
 0x1ad   : > { %v872_v31 = vpop.permute.xlu0 %871  ;;  %v681_v32 = vpop.permute.xlu2 %680 }
 0x1ae   : > { %766 = vst.msk [vmem:[#allocation3 + $0x58] sm:$0xff] %vm754_vm5, %v681_v32  ;;  %v904_v33 = vpop.permute.xlu1 %903 }
 0x1af   : > { %974 = vst.msk [vmem:[#allocation3 + $0xd0] sm:$0xff] %vm947_vm6, %v904_v33  ;;  %v3489_v33 = vld [vmem:[#allocation2 + $0x112] sm:$0xff] }
 0x1b0   : > { %1167 = vst.msk [vmem:[#allocation3 + $0xd0] sm:$0xff] %vm1140_vm7, %v1097_v21 }
 0x1b3   : > { %1261 = vrot.lane.b32.xlu0 %v3282_v56, %s2702_s16  ;;  %1076 = vrot.lane.b32.xlu2 %v996_v1, %s2703_s17  ;;  %s215_s17 = sand.u32 1, %s2689_s19  }
 0x1b4   : > { %1257 = vrot.lane.b32.xlu1 %v3189_v34, %s2702_s16  ;;  %s2516_s6 = sshll.u32 %s215_s17, 8 }
 0x1b5   : > { %v1256_v49 = vpop.permute.xlu0 %1255  ;;  %v717_v35 = vpop.permute.xlu2 %716 }
 0x1b6   : > { %784 = vst.msk [vmem:[#allocation3 + $0xe8] sm:$0xff] %vm754_vm5, %v717_v35  ;;  %v679_v36 = vpop.permute.xlu1 %678 }
 0x1b7   : > { %765 = vst.msk [vmem:[#allocation3 + $0x50] sm:$0xff] %vm754_vm5, %v679_v36 }
 0x1b8   : > { %958 = vst.msk [vmem:[#allocation3 + $0x50] sm:$0xff] %vm947_vm6, %v872_v31  ;;  %v1384_v31 = vld [vmem:[#allocation2 + $0xf2] sm:$0xff] }
 0x1bb   : > { %1267 = vrot.lane.b32.xlu0 %v611_v25, %s2702_s16  ;;  %887 = vrot.lane.b32.xlu2 %v3354_v40, %s2701_s13 }
 0x1bc   : > { %696 = vrot.lane.b32.xlu1 %v613_v41, %s2700_s12 }
 0x1bd   : > { %v908_v34 = vpop.permute.xlu0 %907  ;;  %v1065_v42 = vpop.permute.xlu2 %1064 }
 0x1be   : > { %1151 = vst.msk [vmem:[#allocation3 + $0x50] sm:$0xff] %vm1140_vm7, %v1065_v42  ;;  %v715_v46 = vpop.permute.xlu1 %714 }
 0x1bf   : > { %783 = vst.msk [vmem:[#allocation3 + $0xe0] sm:$0xff] %vm754_vm5, %v715_v46 }
 0x1c0   : > { %976 = vst.msk [vmem:[#allocation3 + $0xe0] sm:$0xff] %vm947_vm6, %v908_v34 }
 0x1c3   : > { %1273 = vrot.lane.b32.xlu0 %v3363_v48, %s2702_s16  ;;  %1265 = vrot.lane.b32.xlu2 %v610_v16, %s2702_s16 }
 0x1c4   : > { %1263 = vrot.lane.b32.xlu1 %v3280_v29, %s2702_s16 }
 0x1c5   : > { %v683_v52 = vpop.permute.xlu0 %682  ;;  %v1101_v37 = vpop.permute.xlu2 %1100 }
 0x1c6   : > { %767 = vst.msk [vmem:[#allocation3 + $0x60] sm:$0xff] %vm754_vm5, %v683_v52  ;;  %v874_v56 = vpop.permute.xlu1 %873  ;;  %v1753_v52 = vld [vmem:[#allocation2 + $0x31] sm:$0xff] }
 0x1c7   : > { %1169 = vst.msk [vmem:[#allocation3 + $0xe0] sm:$0xff] %vm1140_vm7, %v1101_v37 }
 0x1c8   : > { %959 = vst.msk [vmem:[#allocation3 + $0x58] sm:$0xff] %vm947_vm6, %v874_v56 }
 0x1cb   : > { %1279 = vrot.lane.b32.xlu0 %v3019_v61, %s2702_s16  ;;  %1271 = vrot.lane.b32.xlu2 %v613_v41, %s2702_s16  ;;  %v3386_v61 = vld [vmem:[#allocation2 + $0xf9] sm:$0xff] }
 0x1cc   : > { %1269 = vrot.lane.b32.xlu1 %v3318_v15, %s2702_s16  ;;  %v3428_v15 = vld [vmem:[#allocation2 + $0x3a] sm:$0xff] }
 0x1cd   : > { %v719_v57 = vpop.permute.xlu0 %718  ;;  %v876_v62 = vpop.permute.xlu2 %875 }
 0x1ce   : > { %785 = vst.msk [vmem:[#allocation3 + $0xf0] sm:$0xff] %vm754_vm5, %v719_v57  ;;  %v1063_v29 = vpop.permute.xlu1 %1062 }
 0x1cf   : > { %960 = vst.msk [vmem:[#allocation3 + $0x60] sm:$0xff] %vm947_vm6, %v876_v62  ;;  %v1561_v62 = vld [vmem:[#allocation2 + $0x38] sm:$0xff] }
 0x1d0   : > { %1150 = vst.msk [vmem:[#allocation3 + $0x48] sm:$0xff] %vm1140_vm7, %v1063_v29  ;;  %v1560_v29 = vld [vmem:[#allocation2 + $0x30] sm:$0xff] }
 0x1d1   : > { %1343 = vst.msk [vmem:[#allocation3 + $0x48] sm:$0xff] %vm1333_vm8, %v1256_v49  ;;  %v3495_v49 = vld [vmem:[#allocation2 + $0x10a] sm:$0xff] }
 0x1d3   : > { %1285 = vrot.lane.b32.xlu0 %v3099_v51, %s2702_s16  ;;  %1277 = vrot.lane.b32.xlu2 %v3002_v47, %s2702_s16 }
 0x1d4   : > { %1275 = vrot.lane.b32.xlu1 %v3386_v61, %s2702_s16 }
 0x1d5   : > { %v878_v63 = vpop.permute.xlu0 %877  ;;  %v912_v0 = vpop.permute.xlu2 %911 }
 0x1d6   : > { %978 = vst.msk [vmem:[#allocation3 + $0xf0] sm:$0xff] %vm947_vm6, %v912_v0  ;;  %v910_v1 = vpop.permute.xlu1 %909 }
 0x1d7   : > { %977 = vst.msk [vmem:[#allocation3 + $0xe8] sm:$0xff] %vm947_vm6, %v910_v1  ;;  %v1771_v1 = vld [vmem:[#allocation2 + $0x109] sm:$0xff] }
 0x1db   : > { %1291 = vrot.lane.b32.xlu0 %v3206_v55, %s2702_s16  ;;  %1283 = vrot.lane.b32.xlu2 %v3079_v39, %s2702_s16 }
 0x1dc   : > { %1281 = vrot.lane.b32.xlu1 %v3016_v59, %s2702_s16 }
 0x1dd   : > { %v1067_v47 = vpop.permute.xlu0 %1066  ;;  %v687_v51 = vpop.permute.xlu2 %686 }
 0x1de   : > { %1152 = vst.msk [vmem:[#allocation3 + $0x58] sm:$0xff] %vm1140_vm7, %v1067_v47  ;;  %v1099_v2 = vpop.permute.xlu1 %1098  ;;  %v1754_v47 = vld [vmem:[#allocation2 + $0x39] sm:$0xff] }
 0x1df   : > { %769 = vst.msk [vmem:[#allocation3 + $0x70] sm:$0xff] %vm754_vm5, %v687_v51 }
 0x1e0   : > { %1168 = vst.msk [vmem:[#allocation3 + $0xd8] sm:$0xff] %vm1140_vm7, %v1099_v2 }
 0x1e3   : > { %1297 = vrot.lane.b32.xlu0 %v1203_v4, %s2702_s16  ;;  %1289 = vrot.lane.b32.xlu2 %v3182_v30, %s2702_s16 }
 0x1e4   : > { %1287 = vrot.lane.b32.xlu1 %v3097_v50, %s2702_s16 }
 0x1e5   : > { %v914_v39 = vpop.permute.xlu0 %913  ;;  %v882_v59 = vpop.permute.xlu2 %881 }
 0x1e6   : > { %v685_v55 = vpop.permute.xlu1 %684 }
 0x1e7   : > { %768 = vst.msk [vmem:[#allocation3 + $0x68] sm:$0xff] %vm754_vm5, %v685_v55 }
 0x1e8   : > { %961 = vst.msk [vmem:[#allocation3 + $0x68] sm:$0xff] %vm947_vm6, %v878_v63 }
 0x1eb   : > { %1432 = vrot.lane.b32.xlu0 %v1367_v43, %s2704_s23  ;;  %1295 = vrot.lane.b32.xlu2 %v3272_v44, %s2702_s16  ;;  %v3420_v44 = vld [vmem:[#allocation2 + $0x189] sm:$0xff] }
 0x1ec   : > { %1293 = vrot.lane.b32.xlu1 %v3203_v45, %s2702_s16 }
 0x1ed   : > { %v1103_v30 = vpop.permute.xlu0 %1102  ;;  %v1071_v6 = vpop.permute.xlu2 %1070 }
 0x1ee   : > { %1170 = vst.msk [vmem:[#allocation3 + $0xe8] sm:$0xff] %vm1140_vm7, %v1103_v30  ;;  %v721_v50 = vpop.permute.xlu1 %720 }
 0x1ef   : > { %1154 = vst.msk [vmem:[#allocation3 + $0x68] sm:$0xff] %vm1140_vm7, %v1071_v6  ;;  %v1755_v6 = vld [vmem:[#allocation2 + $0x49] sm:$0xff] }
 0x1f0   : > { %786 = vst.msk [vmem:[#allocation3 + $0xf8] sm:$0xff] %vm754_vm5, %v721_v50  ;;  %v1772_v50 = vld [vmem:[#allocation2 + $0x111] sm:$0xff] }
 0x1f1   : > { %979 = vst.msk [vmem:[#allocation3 + $0xf8] sm:$0xff] %vm947_vm6, %v914_v39  ;;  %v1579_v39 = vld [vmem:[#allocation2 + $0x110] sm:$0xff] }
 0x1f3   : > { %1438 = vrot.lane.b32.xlu0 %v3054_v20, %s2704_s23  ;;  %1430 = vrot.lane.b32.xlu2 %v1366_v9, %s2704_s23  ;;  %v3434_v20 = vld [vmem:[#allocation2 + $0x32] sm:$0xff] }
 0x1f4   : > { %1299 = vrot.lane.b32.xlu1 %v3420_v44, %s2702_s16 }
 0x1f5   : > { %v689_v45 = vpop.permute.xlu0 %688  ;;  %v1107_v10 = vpop.permute.xlu2 %1106 }
 0x1f6   : > { %770 = vst.msk [vmem:[#allocation3 + $0x78] sm:$0xff] %vm754_vm5, %v689_v45  ;;  %v1069_v11 = vpop.permute.xlu1 %1068 }
 0x1f7   : > { %963 = vst.msk [vmem:[#allocation3 + $0x78] sm:$0xff] %vm947_vm6, %v882_v59  ;;  %v1578_v59 = vld [vmem:[#allocation2 + $0x108] sm:$0xff] }
 0x1f8   : > { %1172 = vst.msk [vmem:[#allocation3 + $0xf8] sm:$0xff] %vm1140_vm7, %v1107_v10 }
 0x1f9   : > { %1153 = vst.msk [vmem:[#allocation3 + $0x60] sm:$0xff] %vm1140_vm7, %v1069_v11  ;;  %v1563_v11 = vld [vmem:[#allocation2 + $0x50] sm:$0xff] }
 0x1fb   : > { %1444 = vrot.lane.b32.xlu0 %v3116_v58, %s2704_s23  ;;  %1436 = vrot.lane.b32.xlu2 %v3428_v15, %s2704_s23  ;;  %v3444_v58 = vld [vmem:[#allocation2 + $0x52] sm:$0xff] }
 0x1fc   : > { %1434 = vrot.lane.b32.xlu1 %v3434_v20, %s2704_s23 }
 0x1fd   : > { %v1073_v17 = vpop.permute.xlu0 %1072  ;;  %v693_v16 = vpop.permute.xlu2 %692 }
 0x1fe   : > { %772 = vst.msk [vmem:[#allocation3 + $0x88] sm:$0xff] %vm754_vm5, %v693_v16  ;;  %v1105_v18 = vpop.permute.xlu1 %1104 }
 0x1ff   : > { %1171 = vst.msk [vmem:[#allocation3 + $0xf0] sm:$0xff] %vm1140_vm7, %v1105_v18  ;;  %v1773_v18 = vld [vmem:[#allocation2 + $0x121] sm:$0xff] }
 0x203   : > { %1450 = vrot.lane.b32.xlu0 %v3251_v23, %s2704_s23  ;;  %1442 = vrot.lane.b32.xlu2 %v3121_v60, %s2704_s23 }
 0x204   : > { %1440 = vrot.lane.b32.xlu1 %v3444_v58, %s2704_s23 }
 0x205   : > { %v884_v19 = vpop.permute.xlu0 %883  ;;  %v1260_v22 = vpop.permute.xlu2 %1259 }
 0x206   : > { %1345 = vst.msk [vmem:[#allocation3 + $0x58] sm:$0xff] %vm1333_vm8, %v1260_v22  ;;  %v880_v25 = vpop.permute.xlu1 %879 }
 0x207   : > { %962 = vst.msk [vmem:[#allocation3 + $0x70] sm:$0xff] %vm947_vm6, %v880_v25 }
 0x208   : > { %1155 = vst.msk [vmem:[#allocation3 + $0x70] sm:$0xff] %vm1140_vm7, %v1073_v17 }
 0x20b   : > { %1456 = vrot.lane.b32.xlu0 %v3293_v3, %s2704_s23  ;;  %1448 = vrot.lane.b32.xlu2 %v3195_v38, %s2704_s23 }
 0x20c   : > { %1446 = vrot.lane.b32.xlu1 %v3141_v12, %s2704_s23 }
 0x20d   : > { %v695_v60 = vpop.permute.xlu0 %694  ;;  %v1077_v23 = vpop.permute.xlu2 %1076 }
 0x20e   : > { %773 = vst.msk [vmem:[#allocation3 + $0x90] sm:$0xff] %vm754_vm5, %v695_v60  ;;  %v691_v21 = vpop.permute.xlu1 %690 }
 0x20f   : > { %771 = vst.msk [vmem:[#allocation3 + $0x80] sm:$0xff] %vm754_vm5, %v691_v21  ;;  %v1580_v21 = vld [vmem:[#allocation2 + $0x120] sm:$0xff] }
 0x210   : > { %964 = vst.msk [vmem:[#allocation3 + $0x80] sm:$0xff] %vm947_vm6, %v884_v19  ;;  %v1948_v19 = vld [vmem:[#allocation2 + $0x4a] sm:$0xff] }
 0x211   : > { %1157 = vst.msk [vmem:[#allocation3 + $0x80] sm:$0xff] %vm1140_vm7, %v1077_v23  ;;  %v1581_v23 = vld [vmem:[#allocation2 + $0x128] sm:$0xff] }
 0x213   : > { %1462 = vrot.lane.b32.xlu0 %v3354_v40, %s2704_s23  ;;  %1454 = vrot.lane.b32.xlu2 %v3311_v8, %s2704_s23 }
 0x214   : > { %1452 = vrot.lane.b32.xlu1 %v3221_v5, %s2704_s23 }
 0x215   : > { %v890_v12 = vpop.permute.xlu0 %889  ;;  %v888_v38 = vpop.permute.xlu2 %887 }
 0x216   : > { %966 = vst.msk [vmem:[#allocation3 + $0x90] sm:$0xff] %vm947_vm6, %v888_v38  ;;  %v886_v3 = vpop.permute.xlu1 %885 }
 0x217   : > { %1159 = vst.msk [vmem:[#allocation3 + $0x90] sm:$0xff] %vm1140_vm7, %v3112_v54  ;;  %v3479_v54 = vld [vmem:[#allocation2 + $0x122] sm:$0xff] }
 0x218   : > { %965 = vst.msk [vmem:[#allocation3 + $0x88] sm:$0xff] %vm947_vm6, %v886_v3 }
 0x21b   : > { %1468 = vrot.lane.b32.xlu0 %v1385_v27, %s2704_s23  ;;  %1460 = vrot.lane.b32.xlu2 %v3332_v26, %s2704_s23 }
 0x21c   : > { %1458 = vrot.lane.b32.xlu1 %v3303_v7, %s2704_s23 }
 0x21d   : > { %v1079_v5 = vpop.permute.xlu0 %1078  ;;  %v1266_v8 = vpop.permute.xlu2 %1265 }
 0x21e   : > { %1158 = vst.msk [vmem:[#allocation3 + $0x88] sm:$0xff] %vm1140_vm7, %v1079_v5  ;;  %v1075_v28 = vpop.permute.xlu1 %1074  ;;  %v1774_v5 = vld [vmem:[#allocation2 + $0x129] sm:$0xff] }
 0x21f   : > { %1348 = vst.msk [vmem:[#allocation3 + $0x70] sm:$0xff] %vm1333_vm8, %v1266_v8 }
 0x220   : > { %1156 = vst.msk [vmem:[#allocation3 + $0x78] sm:$0xff] %vm1140_vm7, %v1075_v28 }
 0x223   : > { %1474 = vrot.lane.b32.xlu0 %v3479_v54, %s2704_s23  ;;  %1466 = vrot.lane.b32.xlu2 %v1384_v31, %s2704_s23 }
 0x224   : > { %1464 = vrot.lane.b32.xlu1 %v3327_v24, %s2704_s23 }
 0x225   : > { %v1262_v7 = vpop.permute.xlu0 %1261  ;;  %v1272_v26 = vpop.permute.xlu2 %1271 }
 0x226   : > { %1346 = vst.msk [vmem:[#allocation3 + $0x60] sm:$0xff] %vm1333_vm8, %v1262_v7  ;;  %v1258_v32 = vpop.permute.xlu1 %1257  ;;  %v1951_v7 = vld [vmem:[#allocation2 + $0x6a] sm:$0xff] }
 0x227   : > { %1351 = vst.msk [vmem:[#allocation3 + $0x88] sm:$0xff] %vm1333_vm8, %v1272_v26  ;;  %v1565_v26 = vld [vmem:[#allocation2 + $0x68] sm:$0xff] }
 0x228   : > { %1344 = vst.msk [vmem:[#allocation3 + $0x50] sm:$0xff] %vm1333_vm8, %v1258_v32  ;;  %v1564_v32 = vld [vmem:[#allocation2 + $0x60] sm:$0xff] }
 0x22b   : > { %1480 = vrot.lane.b32.xlu0 %v3143_v13, %s2704_s23  ;;  %1472 = vrot.lane.b32.xlu2 %v3489_v33, %s2704_s23  ;;  %v3509_v13 = vld [vmem:[#allocation2 + $0x12a] sm:$0xff] }
 0x22c   : > { %1470 = vrot.lane.b32.xlu1 %v3495_v49, %s2704_s23 }
 0x22d   : > { %v1268_v24 = vpop.permute.xlu0 %1267  ;;  %v1278_v35 = vpop.permute.xlu2 %1277 }
 0x22e   : > { %1349 = vst.msk [vmem:[#allocation3 + $0x78] sm:$0xff] %vm1333_vm8, %v1268_v24  ;;  %v697_v36 = vpop.permute.xlu1 %696 }
 0x22f   : > { %1354 = vst.msk [vmem:[#allocation3 + $0xa0] sm:$0xff] %vm1333_vm8, %v1278_v35 }
 0x230   : > { %774 = vst.msk [vmem:[#allocation3 + $0x98] sm:$0xff] %vm754_vm5, %v697_v36 }
 0x231   : > { %967 = vst.msk [vmem:[#allocation3 + $0x98] sm:$0xff] %vm947_vm6, %v890_v12 }
 0x232   : > { %1160 = vst.msk [vmem:[#allocation3 + $0x98] sm:$0xff] %vm1140_vm7, %v3109_v53  ;;  %v1577_v53 = vld [vmem:[#allocation2 + $0xf8] sm:$0xff] }
 0x233   : > { %1849 = vrot.lane.b32.xlu0 %v3363_v48, %s2705_s25  ;;  %1478 = vrot.lane.b32.xlu2 %v3149_v14, %s2704_s23  ;;  %v1576_v14 = vld [vmem:[#allocation2 + $0xf0] sm:$0xff] }
 0x234   : > { %1476 = vrot.lane.b32.xlu1 %v3509_v13, %s2704_s23 }
 0x235   : > { %v1274_v40 = vpop.permute.xlu0 %1273  ;;  %v1284_v41 = vpop.permute.xlu2 %1283 }
 0x236   : > { %1352 = vst.msk [vmem:[#allocation3 + $0x90] sm:$0xff] %vm1333_vm8, %v1274_v40  ;;  %v1264_v34 = vpop.permute.xlu1 %1263  ;;  %v1775_v40 = vld [vmem:[#allocation2 + $0x139] sm:$0xff] }
 0x237   : > { %1357 = vst.msk [vmem:[#allocation3 + $0xb8] sm:$0xff] %vm1333_vm8, %v1284_v41  ;;  %v1950_v41 = vld [vmem:[#allocation2 + $0x62] sm:$0xff] }
 0x238   : > { %1347 = vst.msk [vmem:[#allocation3 + $0x68] sm:$0xff] %vm1333_vm8, %v1264_v34  ;;  %v1758_v34 = vld [vmem:[#allocation2 + $0x69] sm:$0xff] }
 0x23b   : > { %2044 = vrot.lane.b32.xlu0 %v1385_v27, %s2706_s26  ;;  %1658 = vrot.lane.b32.xlu2 %v1577_v53, %s2707_s30  ;;  %v1757_v27 = vld [vmem:[#allocation2 + $0x61] sm:$0xff]  ;;  %v2576_v53 = vld [vmem:[%s3941_s3 + $0x18] sm:$0xff] }
 0x23c   : > { %1656 = vrot.lane.b32.xlu1 %v1576_v14, %s2707_s30 }
 0x23d   : > { %v1280_v42 = vpop.permute.xlu0 %1279  ;;  %v1290_v46 = vpop.permute.xlu2 %1289 }
 0x23e   : > { %1355 = vst.msk [vmem:[#allocation3 + $0xa8] sm:$0xff] %vm1333_vm8, %v1280_v42  ;;  %v1270_v48 = vpop.permute.xlu1 %1269 }
 0x23f   : > { %1360 = vst.msk [vmem:[#allocation3 + $0xd0] sm:$0xff] %vm1333_vm8, %v1290_v46 }
 0x240   : > { %1350 = vst.msk [vmem:[#allocation3 + $0x80] sm:$0xff] %vm1333_vm8, %v1270_v48  ;;  %v2575_v48 = vld [vmem:[%s3941_s3 + $0x10] sm:$0xff] }
 0x243   : > { %1817 = vrot.lane.b32.xlu0 %v1753_v52, %s2705_s25  ;;  %2042 = vrot.lane.b32.xlu2 %v1384_v31, %s2706_s26  ;;  %v1969_v52 = vld [vmem:[#allocation2 + $0x142] sm:$0xff] }
 0x244   : > { %1851 = vrot.lane.b32.xlu1 %v3386_v61, %s2705_s25 }
 0x245   : > { %v1286_v37 = vpop.permute.xlu0 %1285  ;;  %v1296_v56 = vpop.permute.xlu2 %1295 }
 0x246   : > { %1358 = vst.msk [vmem:[#allocation3 + $0xc0] sm:$0xff] %vm1333_vm8, %v1286_v37  ;;  %v1276_v57 = vpop.permute.xlu1 %1275  ;;  %v1583_v37 = vld [vmem:[#allocation2 + $0x140] sm:$0xff] }
 0x247   : > { %1363 = vst.msk [vmem:[#allocation3 + $0xe8] sm:$0xff] %vm1333_vm8, %v1296_v56  ;;  %v1582_v56 = vld [vmem:[#allocation2 + $0x138] sm:$0xff] }
 0x248   : > { %1353 = vst.msk [vmem:[#allocation3 + $0x98] sm:$0xff] %vm1333_vm8, %v1276_v57  ;;  %v2574_v57 = vld [vmem:[%s3941_s3 + $0x8] sm:$0xff] }
 0x24b   : > { %2012 = vrot.lane.b32.xlu0 %v3428_v15, %s2706_s26  ;;  %1626 = vrot.lane.b32.xlu2 %v1561_v62, %s2707_s30  ;;  %v1562_v15 = vld [vmem:[#allocation2 + $0x48] sm:$0xff] }
 0x24c   : > { %1624 = vrot.lane.b32.xlu1 %v1560_v29, %s2707_s30 }
 0x24d   : > { %v1292_v61 = vpop.permute.xlu0 %1291  ;;  %v1431_v63 = vpop.permute.xlu2 %1430 }
 0x24e   : > { %1361 = vst.msk [vmem:[#allocation3 + $0xd8] sm:$0xff] %vm1333_vm8, %v1292_v61  ;;  %v1282_v0 = vpop.permute.xlu1 %1281 }
 0x24f   : > { %1527 = vst.msk [vmem:[#allocation3] sm:$0xff] %vm1526_vm9, %v1431_v63  ;;  %v2573_v63 = vld [vmem:[%s3941_s3] sm:$0xff] }
 0x250   : > { %1356 = vst.msk [vmem:[#allocation3 + $0xb0] sm:$0xff] %vm1333_vm8, %v1282_v0  ;;  %v1759_v0 = vld [vmem:[#allocation2 + $0x79] sm:$0xff] }
 0x253   : > { %1853 = vrot.lane.b32.xlu0 %v1771_v1, %s2705_s25  ;;  %2010 = vrot.lane.b32.xlu2 %v3434_v20, %s2706_s26  ;;  %v1968_v1 = vld [vmem:[#allocation2 + $0x13a] sm:$0xff] }
 0x254   : > { %1819 = vrot.lane.b32.xlu1 %v1754_v47, %s2705_s25  ;;  %v1776_v47 = vld [vmem:[#allocation2 + $0x141] sm:$0xff] }
 0x255   : > { %v1298_v51 = vpop.permute.xlu0 %1297  ;;  %v1437_v2 = vpop.permute.xlu2 %1436 }
 0x256   : > { %1364 = vst.msk [vmem:[#allocation3 + $0xf0] sm:$0xff] %vm1333_vm8, %v1298_v51  ;;  %v1288_v4 = vpop.permute.xlu1 %1287 }
 0x257   : > { %1530 = vst.msk [vmem:[#allocation3 + $0x18] sm:$0xff] %vm1526_vm9, %v1437_v2 }
 0x258   : > { %1359 = vst.msk [vmem:[#allocation3 + $0xc8] sm:$0xff] %vm1333_vm8, %v1288_v4 }
 0x25b   : > { %2048 = vrot.lane.b32.xlu0 %v3489_v33, %s2706_s26  ;;  %1662 = vrot.lane.b32.xlu2 %v1579_v39, %s2707_s30  ;;  %v1953_v39 = vld [vmem:[#allocation2 + $0x82] sm:$0xff] }
 0x25c   : > { %1660 = vrot.lane.b32.xlu1 %v1578_v59, %s2707_s30  ;;  %v1567_v59 = vld [vmem:[#allocation2 + $0x80] sm:$0xff] }
 0x25d   : > { %v1433_v55 = vpop.permute.xlu0 %1432  ;;  %v1443_v43 = vpop.permute.xlu2 %1442 }
 0x25e   : > { %1528 = vst.msk [vmem:[#allocation3 + $0x8] sm:$0xff] %vm1526_vm9, %v1433_v55  ;;  %v1294_v30 = vpop.permute.xlu1 %1293  ;;  %v1566_v55 = vld [vmem:[#allocation2 + $0x78] sm:$0xff] }
 0x25f   : > { %1533 = vst.msk [vmem:[#allocation3 + $0x30] sm:$0xff] %vm1526_vm9, %v1443_v43 }
 0x260   : > { %1362 = vst.msk [vmem:[#allocation3 + $0xe0] sm:$0xff] %vm1333_vm8, %v1294_v30 }
 0x263   : > { %1821 = vrot.lane.b32.xlu0 %v1755_v6, %s2705_s25  ;;  %2046 = vrot.lane.b32.xlu2 %v3495_v49, %s2706_s26 }
 0x264   : > { %1855 = vrot.lane.b32.xlu1 %v1772_v50, %s2705_s25  ;;  %v1777_v50 = vld [vmem:[#allocation2 + $0x151] sm:$0xff] }
 0x265   : > { %v1439_v9 = vpop.permute.xlu0 %1438  ;;  %v1449_v45 = vpop.permute.xlu2 %1448 }
 0x266   : > { %1531 = vst.msk [vmem:[#allocation3 + $0x20] sm:$0xff] %vm1526_vm9, %v1439_v9  ;;  %v1300_v10 = vpop.permute.xlu1 %1299  ;;  %v1952_v9 = vld [vmem:[#allocation2 + $0x7a] sm:$0xff] }
 0x267   : > { %1536 = vst.msk [vmem:[#allocation3 + $0x48] sm:$0xff] %vm1526_vm9, %v1449_v45  ;;  %v1760_v45 = vld [vmem:[#allocation2 + $0x81] sm:$0xff] }
 0x268   : > { %1365 = vst.msk [vmem:[#allocation3 + $0xf8] sm:$0xff] %vm1333_vm8, %v1300_v10 }
 0x26b   : > { %2016 = vrot.lane.b32.xlu0 %v3444_v58, %s2706_s26  ;;  %1630 = vrot.lane.b32.xlu2 %v1563_v11, %s2707_s30  ;;  %v1756_v58 = vld [vmem:[#allocation2 + $0x51] sm:$0xff] }
 0x26c   : > { %1628 = vrot.lane.b32.xlu1 %v1562_v15, %s2707_s30 }
 0x26d   : > { %v1445_v20 = vpop.permute.xlu0 %1444  ;;  %v1455_v17 = vpop.permute.xlu2 %1454 }
 0x26e   : > { %1534 = vst.msk [vmem:[#allocation3 + $0x38] sm:$0xff] %vm1526_vm9, %v1445_v20  ;;  %v1435_v16 = vpop.permute.xlu1 %1434  ;;  %v1971_v20 = vld [vmem:[#allocation2 + $0x15a] sm:$0xff] }
 0x26f   : > { %1539 = vst.msk [vmem:[#allocation3 + $0x60] sm:$0xff] %vm1526_vm9, %v1455_v17  ;;  %v1585_v17 = vld [vmem:[#allocation2 + $0x158] sm:$0xff] }
 0x270   : > { %1529 = vst.msk [vmem:[#allocation3 + $0x10] sm:$0xff] %vm1526_vm9, %v1435_v16  ;;  %v1584_v16 = vld [vmem:[#allocation2 + $0x150] sm:$0xff] }
 0x273   : > { %1857 = vrot.lane.b32.xlu0 %v1773_v18, %s2705_s25  ;;  %2014 = vrot.lane.b32.xlu2 %v1948_v19, %s2706_s26 }
 0x274   : > { %1823 = vrot.lane.b32.xlu1 %v1756_v58, %s2705_s25 }
 0x275   : > { %v1451_v22 = vpop.permute.xlu0 %1450  ;;  %v1461_v25 = vpop.permute.xlu2 %1460 }
 0x276   : > { %1537 = vst.msk [vmem:[#allocation3 + $0x50] sm:$0xff] %vm1526_vm9, %v1451_v22  ;;  %v1441_v60 = vpop.permute.xlu1 %1440 }
 0x277   : > { %1542 = vst.msk [vmem:[#allocation3 + $0x78] sm:$0xff] %vm1526_vm9, %v1461_v25 }
 0x278   : > { %1532 = vst.msk [vmem:[#allocation3 + $0x28] sm:$0xff] %vm1526_vm9, %v1441_v60 }
 0x27b   : > { %2052 = vrot.lane.b32.xlu0 %v3509_v13, %s2706_s26  ;;  %1666 = vrot.lane.b32.xlu2 %v1581_v23, %s2707_s30  ;;  %v1761_v23 = vld [vmem:[#allocation2 + $0x91] sm:$0xff] }
 0x27c   : > { %1664 = vrot.lane.b32.xlu1 %v1580_v21, %s2707_s30  ;;  %v1970_v21 = vld [vmem:[#allocation2 + $0x152] sm:$0xff] }
 0x27d   : > { %v1457_v12 = vpop.permute.xlu0 %1456  ;;  %v1467_v38 = vpop.permute.xlu2 %1466 }
 0x27e   : > { %1540 = vst.msk [vmem:[#allocation3 + $0x68] sm:$0xff] %vm1526_vm9, %v1457_v12  ;;  %v1447_v3 = vpop.permute.xlu1 %1446  ;;  %v1778_v12 = vld [vmem:[#allocation2 + $0x159] sm:$0xff] }
 0x27f   : > { %1545 = vst.msk [vmem:[#allocation3 + $0x90] sm:$0xff] %vm1526_vm9, %v1467_v38 }
 0x280   : > { %1535 = vst.msk [vmem:[#allocation3 + $0x40] sm:$0xff] %vm1526_vm9, %v1447_v3 }
 0x283   : > { %1825 = vrot.lane.b32.xlu0 %v1757_v27, %s2705_s25  ;;  %2050 = vrot.lane.b32.xlu2 %v3479_v54, %s2706_s26  ;;  %v2195_v54 = vld [vmem:[%s3941_s3 + $0x20] sm:$0xf] }
 0x284   : > { %1859 = vrot.lane.b32.xlu1 %v1774_v5, %s2705_s25  ;;  %v2217_v24 = vunpack.c.l.b16 %v2195_v54  ;;  %v1955_v5 = vld [vmem:[#allocation2 + $0x9a] sm:$0xff] }
 0x285   : > { %v1463_v8 = vpop.permute.xlu0 %1462  ;;  %v1473_v28 = vpop.permute.xlu2 %1472 }
 0x286   : > { %1543 = vst.msk [vmem:[#allocation3 + $0x80] sm:$0xff] %vm1526_vm9, %v1463_v8  ;;  %v1453_v31 = vpop.permute.xlu1 %1452  ;;  %v2222_v36 = vpack.c.b16 %v2217_v24, %v2217_v24  ;;  %v1569_v8 = vld [vmem:[#allocation2 + $0x98] sm:$0xff] }
 0x287   : > { %1548 = vst.msk [vmem:[#allocation3 + $0xa8] sm:$0xff] %vm1526_vm9, %v1473_v28  ;;  %v1568_v28 = vld [vmem:[#allocation2 + $0x90] sm:$0xff] }
 0x288   : > { %1538 = vst.msk [vmem:[#allocation3 + $0x58] sm:$0xff] %vm1526_vm9, %v1453_v31  ;;  %v2278_v13 = vsel %vm2276_vm10, %v2222_v36, 0  ;;  %v1954_v24 = vld [vmem:[#allocation2 + $0x92] sm:$0xff] }
 0x289   : > { %2579 = vmatpush.bf16.msra.mxu2 %v2278_v13  ;;  %2283 = vmatpush.bf16.msra.mxu1 %v2278_v13 }
 0x28b   : > { %2020 = vrot.lane.b32.xlu0 %v1951_v7, %s2706_s26  ;;  %1634 = vrot.lane.b32.xlu2 %v1565_v26, %s2707_s30 }
 0x28c   : > { %1632 = vrot.lane.b32.xlu1 %v1564_v32, %s2707_s30 }
 0x28d   : > { %v1469_v33 = vpop.permute.xlu0 %1468  ;;  %v1479_v49 = vpop.permute.xlu2 %1478  ;;  %2580 = vmatpush.bf16.msra.mxu2 %v2576_v53  ;;  %2284 = vmatpush.bf16.msra.mxu1 %v2576_v53 }
 0x28e   : > { %1546 = vst.msk [vmem:[#allocation3 + $0x98] sm:$0xff] %vm1526_vm9, %v1469_v33  ;;  %v1459_v35 = vpop.permute.xlu1 %1458 }
 0x28f   : > { %1551 = vst.msk [vmem:[#allocation3 + $0xc0] sm:$0xff] %vm1526_vm9, %v1479_v49  ;;  %v1586_v49 = vld [vmem:[#allocation2 + $0x168] sm:$0xff] }
 0x290   : > { %1541 = vst.msk [vmem:[#allocation3 + $0x70] sm:$0xff] %vm1526_vm9, %v1459_v35  ;;  %v1762_v35 = vld [vmem:[#allocation2 + $0x99] sm:$0xff] }
 0x291   : > { %2581 = vmatpush.bf16.msra.mxu2 %v2575_v48  ;;  %2285 = vmatpush.bf16.msra.mxu1 %v2575_v48 }
 0x293   : > { %1861 = vrot.lane.b32.xlu0 %v1775_v40, %s2705_s25  ;;  %2018 = vrot.lane.b32.xlu2 %v1950_v41, %s2706_s26  ;;  %v1780_v41 = vld [vmem:[#allocation2 + $0x171] sm:$0xff] }
 0x294   : > { %1827 = vrot.lane.b32.xlu1 %v1758_v34, %s2705_s25 }
 0x295   : > { %v1475_v14 = vpop.permute.xlu0 %1474  ;;  %v1659_v42 = vpop.permute.xlu2 %1658  ;;  %2582 = vmatpush.bf16.msra.mxu2 %v2574_v57  ;;  %2286 = vmatpush.bf16.msra.mxu1 %v2574_v57 }
 0x296   : > { %1549 = vst.msk [vmem:[#allocation3 + $0xb0] sm:$0xff] %vm1526_vm9, %v1475_v14  ;;  %v1465_v46 = vpop.permute.xlu1 %1464 }
 0x297   : > { %1544 = vst.msk [vmem:[#allocation3 + $0x88] sm:$0xff] %vm1526_vm9, %v1465_v46 }
 0x298   : > { %1738 = vst.msk [vmem:[#allocation3 + $0x88] sm:$0xff] %vm1720_vm11, %v1659_v42 }
 0x299   : > { %2583 = vmatpush.bf16.msra.mxu2 %v2573_v63  ;;  %2287 = vmatpush.bf16.msra.mxu1 %v2573_v63  ;;  %v1973_v63 = vld [vmem:[#allocation2 + $0x172] sm:$0xff] }
 0x29b   : > { %2056 = vrot.lane.b32.xlu0 %v1969_v52, %s2706_s26  ;;  %1670 = vrot.lane.b32.xlu2 %v1583_v37, %s2707_s30  ;;  %v1570_v52 = vld [vmem:[#allocation2 + $0xa8] sm:$0xff] }
 0x29c   : > { %1668 = vrot.lane.b32.xlu1 %v1582_v56, %s2707_s30  ;;  %v1779_v37 = vld [vmem:[#allocation2 + $0x169] sm:$0xff] }
 0x29d   : > { %v1481_v62 = vpop.permute.xlu0 %1480  ;;  %v2043_v29 = vpop.permute.xlu2 %2042  ;;  %v1587_v56 = vld [vmem:[#allocation2 + $0x170] sm:$0xff] }
 0x29e   : > { %1552 = vst.msk [vmem:[#allocation3 + $0xc8] sm:$0xff] %vm1526_vm9, %v1481_v62  ;;  %v1471_v61 = vpop.permute.xlu1 %1470 }
 0x29f   : > { %1547 = vst.msk [vmem:[#allocation3 + $0xa0] sm:$0xff] %vm1526_vm9, %v1471_v61  ;;  %v1764_v61 = vld [vmem:[#allocation2 + $0xb1] sm:$0xff] }
 0x2a3   : > { %1829 = vrot.lane.b32.xlu0 %v1759_v0, %s2705_s25  ;;  %2054 = vrot.lane.b32.xlu2 %v1968_v1, %s2706_s26  ;;  %v1972_v0 = vld [vmem:[#allocation2 + $0x16a] sm:$0xff] }
 0x2a4   : > { %1863 = vrot.lane.b32.xlu1 %v1776_v47, %s2705_s25 }
 0x2a5   : > { %v1850_v51 = vpop.permute.xlu0 %1849  ;;  %v1627_v2 = vpop.permute.xlu2 %1626 }
 0x2a6   : > { %1722 = vst.msk [vmem:[#allocation3 + $0x8] sm:$0xff] %vm1720_vm11, %v1627_v2  ;;  %v1477_v4 = vpop.permute.xlu1 %1476 }
 0x2a7   : > { %1550 = vst.msk [vmem:[#allocation3 + $0xb8] sm:$0xff] %vm1526_vm9, %v1477_v4 }
 0x2ab   : > { %2024 = vrot.lane.b32.xlu0 %v1953_v39, %s2706_s26  ;;  %1638 = vrot.lane.b32.xlu2 %v1567_v59, %s2707_s30  ;;  %v1763_v59 = vld [vmem:[#allocation2 + $0xa9] sm:$0xff] }
 0x2ac   : > { %1636 = vrot.lane.b32.xlu1 %v1566_v55, %s2707_s30  ;;  %v1571_v55 = vld [vmem:[#allocation2 + $0xb0] sm:$0xff] }
 0x2ad   : > { %v2045_v43 = vpop.permute.xlu0 %2044  ;;  %v2011_v30 = vpop.permute.xlu2 %2010 }
 0x2ae   : > { %v1657_v6 = vpop.permute.xlu1 %1656 }
 0x2af   : > { %1737 = vst.msk [vmem:[#allocation3 + $0x80] sm:$0xff] %vm1720_vm11, %v1657_v6 }
 0x2b0   : > { %1930 = vst.msk [vmem:[#allocation3 + $0x80] sm:$0xff] %vm1913_vm12, %v1850_v51 }
 0x2b1   : > { %2123 = vst.msk [vmem:[#allocation3 + $0x80] sm:$0xff] %vm2106_vm13, %v2043_v29 }
 0x2b3   : > { %1865 = vrot.lane.b32.xlu0 %v1777_v50, %s2705_s25  ;;  %2022 = vrot.lane.b32.xlu2 %v1952_v9, %s2706_s26  ;;  %v1589_v50 = vld [vmem:[#allocation2 + $0x188] sm:$0xff]  ;;  %v1957_v9 = vld [vmem:[#allocation2 + $0xb2] sm:$0xff] }
 0x2b4   : > { %1831 = vrot.lane.b32.xlu1 %v1760_v45, %s2705_s25  ;;  %v1956_v45 = vld [vmem:[#allocation2 + $0xaa] sm:$0xff] }
 0x2b5   : > { %v1818_v10 = vpop.permute.xlu0 %1817  ;;  %v1663_v11 = vpop.permute.xlu2 %1662 }
 0x2b6   : > { %1740 = vst.msk [vmem:[#allocation3 + $0x98] sm:$0xff] %vm1720_vm11, %v1663_v11  ;;  %v1852_v15 = vpop.permute.xlu1 %1851 }
 0x2b7   : > { %1931 = vst.msk [vmem:[#allocation3 + $0x88] sm:$0xff] %vm1913_vm12, %v1852_v15 }
 0x2b8   : > { %2124 = vst.msk [vmem:[#allocation3 + $0x88] sm:$0xff] %vm2106_vm13, %v2045_v43  ;;  %v2155_v22 = vld [vmem:[#allocation3 + $0x80] sm:$0xff] }
 0x2bb   : > { %2060 = vrot.lane.b32.xlu0 %v1971_v20, %s2706_s26  ;;  %1674 = vrot.lane.b32.xlu2 %v1585_v17, %s2707_s30 }
 0x2bc   : > { %1672 = vrot.lane.b32.xlu1 %v1584_v16, %s2707_s30 }
 0x2bd   : > { %v2013_v18 = vpop.permute.xlu0 %2012  ;;  %v2047_v19 = vpop.permute.xlu2 %2046 }
 0x2be   : > { %v1625_v58 = vpop.permute.xlu1 %1624 }
 0x2bf   : > { %1721 = vst.msk [vmem:[#allocation3] sm:$0xff] %vm1720_vm11, %v1625_v58  ;;  %v2156_v25 = vld [vmem:[#allocation3 + $0x88] sm:$0xff] }
 0x2c0   : > { %1914 = vst.msk [vmem:[#allocation3] sm:$0xff] %vm1913_vm12, %v1818_v10  ;;  %v2179_v60 = vpack.c.bf16 %v2156_v25, %v2155_v22 }
 0x2c1   : > { %2107 = vst.msk [vmem:[#allocation3] sm:$0xff] %vm2106_vm13, %v2011_v30 }
 0x2c2   : > { %2559 = vmatmul.msk.bf16.vlgmr.msra.gmra.mxu2 %vm2227_vm14, %v2179_v60  ;;  %v1573_v60 = vld [vmem:[#allocation2 + $0xc8] sm:$0xff] }
 0x2c3   : > { %1833 = vrot.lane.b32.xlu0 %v1761_v23, %s2705_s25  ;;  %2058 = vrot.lane.b32.xlu2 %v1970_v21, %s2706_s26  ;;  %v1781_v23 = vld [vmem:[#allocation2 + $0x181] sm:$0xff] }
 0x2c4   : > { %1867 = vrot.lane.b32.xlu1 %v1778_v12, %s2705_s25 }
 0x2c5   : > { %v1854_v38 = vpop.permute.xlu0 %1853  ;;  %v1631_v3 = vpop.permute.xlu2 %1630 }
 0x2c6   : > { %1724 = vst.msk [vmem:[#allocation3 + $0x18] sm:$0xff] %vm1720_vm11, %v1631_v3  ;;  %v1820_v27 = vpop.permute.xlu1 %1819 }
 0x2c7   : > { %1915 = vst.msk [vmem:[#allocation3 + $0x8] sm:$0xff] %vm1913_vm12, %v1820_v27 }
 0x2c8   : > { %2108 = vst.msk [vmem:[#allocation3 + $0x8] sm:$0xff] %vm2106_vm13, %v2013_v18  ;;  %v2139_v32 = vld [vmem:[#allocation3] sm:$0xff]  ;;  %v1974_v18 = vld [vmem:[#allocation2 + $0x182] sm:$0xff] }
 0x2cb   : > { %2028 = vrot.lane.b32.xlu0 %v1955_v5, %s2706_s26  ;;  %1642 = vrot.lane.b32.xlu2 %v1569_v8, %s2707_s30  ;;  %v1958_v8 = vld [vmem:[#allocation2 + $0xc2] sm:$0xff] }
 0x2cc   : > { %1640 = vrot.lane.b32.xlu1 %v1568_v28, %s2707_s30  ;;  %v1572_v28 = vld [vmem:[#allocation2 + $0xc0] sm:$0xff] }
 0x2cd   : > { %v2049_v31 = vpop.permute.xlu0 %2048  ;;  %v2015_v7 = vpop.permute.xlu2 %2014 }
 0x2ce   : > { %v1661_v26 = vpop.permute.xlu1 %1660 }
 0x2cf   : > { %1739 = vst.msk [vmem:[#allocation3 + $0x90] sm:$0xff] %vm1720_vm11, %v1661_v26  ;;  %v2140_v54 = vld [vmem:[#allocation3 + $0x8] sm:$0xff] }
 0x2d0   : > { %1932 = vst.msk [vmem:[#allocation3 + $0x90] sm:$0xff] %vm1913_vm12, %v1854_v38  ;;  %v2171_v33 = vpack.c.bf16 %v2140_v54, %v2139_v32  ;;  %v1766_v32 = vld [vmem:[#allocation2 + $0xc9] sm:$0xff]  ;;  %v1765_v54 = vld [vmem:[#allocation2 + $0xc1] sm:$0xff] }
 0x2d1   : > { %2125 = vst.msk [vmem:[#allocation3 + $0x90] sm:$0xff] %vm2106_vm13, %v2047_v19  ;;  %v1588_v19 = vld [vmem:[#allocation2 + $0x180] sm:$0xff] }
 0x2d2   : > { %2551 = vmatmul.msk.bf16.vlgmr.msra.gmra.mxu1 %vm2227_vm14, %v2171_v33 }
 0x2d3   : > { %1676 = vrot.lane.b32.xlu0 %v1586_v49, %s2707_s30  ;;  %2026 = vrot.lane.b32.xlu2 %v1954_v24, %s2706_s26 }
 0x2d4   : > { %1835 = vrot.lane.b32.xlu1 %v1762_v35, %s2705_s25 }
 0x2d5   : > { %v1822_v36 = vpop.permute.xlu0 %1821  ;;  %v1667_v13 = vpop.permute.xlu2 %1666 }
 0x2d6   : > { %1742 = vst.msk [vmem:[#allocation3 + $0xa8] sm:$0xff] %vm1720_vm11, %v1667_v13  ;;  %v1856_v40 = vpop.permute.xlu1 %1855  ;;  %v1783_v13 = vld [vmem:[#allocation2 + $0x199] sm:$0xff] }
 0x2d7   : > { %1933 = vst.msk [vmem:[#allocation3 + $0x98] sm:$0xff] %vm1913_vm12, %v1856_v40 }
 0x2d8   : > { %2126 = vst.msk [vmem:[#allocation3 + $0x98] sm:$0xff] %vm2106_vm13, %v2049_v31  ;;  %v2157_v42 = vld [vmem:[#allocation3 + $0x90] sm:$0xff] }
 0x2db   : > { %1871 = vrot.lane.b32.xlu0 %v1780_v41, %s2705_s25  ;;  %1484 = vrot.lane.b32.xlu2 %v1971_v20, %s2704_s23  ;;  %v1959_v41 = vld [vmem:[#allocation2 + $0xca] sm:$0xff] }
 0x2dc   : > { %1482 = vrot.lane.b32.xlu1 %v1970_v21, %s2704_s23 }
 0x2dd   : > { %v2017_v34 = vpop.permute.xlu0 %2016  ;;  %v2051_v53 = vpop.permute.xlu2 %2050 }
 0x2de   : > { %v1629_v14 = vpop.permute.xlu1 %1628 }
 0x2df   : > { %1723 = vst.msk [vmem:[#allocation3 + $0x10] sm:$0xff] %vm1720_vm11, %v1629_v14  ;;  %v2158_v46 = vld [vmem:[#allocation3 + $0x98] sm:$0xff] }
 0x2e0   : > { %1916 = vst.msk [vmem:[#allocation3 + $0x10] sm:$0xff] %vm1913_vm12, %v1822_v36  ;;  %v2180_v48 = vpack.c.bf16 %v2158_v46, %v2157_v42  ;;  %v1977_v42 = vld [vmem:[#allocation2 + $0x1a2] sm:$0xff] }
 0x2e1   : > { %2109 = vst.msk [vmem:[#allocation3 + $0x10] sm:$0xff] %vm2106_vm13, %v2015_v7  ;;  %v1591_v46 = vld [vmem:[#allocation2 + $0x1a0] sm:$0xff] }
 0x2e2   : > { %2560 = vmatmul.msk.bf16.gmra.mxu2 %vm2227_vm14, %v2180_v48  ;;  %v1590_v48 = vld [vmem:[#allocation2 + $0x198] sm:$0xff] }
 0x2e3   : > { %1644 = vrot.lane.b32.xlu0 %v1570_v52, %s2707_s30  ;;  %1869 = vrot.lane.b32.xlu2 %v1779_v37, %s2705_s25 }
 0x2e4   : > { %1678 = vrot.lane.b32.xlu1 %v1587_v56, %s2707_s30 }
 0x2e5   : > { %v1858_v57 = vpop.permute.xlu0 %1857  ;;  %v1635_v62 = vpop.permute.xlu2 %1634 }
 0x2e6   : > { %1726 = vst.msk [vmem:[#allocation3 + $0x28] sm:$0xff] %vm1720_vm11, %v1635_v62  ;;  %v1824_v29 = vpop.permute.xlu1 %1823 }
 0x2e7   : > { %1917 = vst.msk [vmem:[#allocation3 + $0x18] sm:$0xff] %vm1913_vm12, %v1824_v29  ;;  %v1976_v29 = vld [vmem:[#allocation2 + $0x19a] sm:$0xff] }
 0x2e8   : > { %2110 = vst.msk [vmem:[#allocation3 + $0x18] sm:$0xff] %vm2106_vm13, %v2017_v34  ;;  %v2141_v2 = vld [vmem:[#allocation3 + $0x10] sm:$0xff] }
 0x2eb   : > { %1839 = vrot.lane.b32.xlu0 %v1764_v61, %s2705_s25  ;;  %2064 = vrot.lane.b32.xlu2 %v1973_v63, %s2706_s26 }
 0x2ec   : > { %2062 = vrot.lane.b32.xlu1 %v1972_v0, %s2706_s26 }
 0x2ed   : > { %v2053_v1 = vpop.permute.xlu0 %2052  ;;  %v2019_v47 = vpop.permute.xlu2 %2018 }
 0x2ee   : > { %v1665_v51 = vpop.permute.xlu1 %1664 }
 0x2ef   : > { %1741 = vst.msk [vmem:[#allocation3 + $0xa0] sm:$0xff] %vm1720_vm11, %v1665_v51  ;;  %v2142_v4 = vld [vmem:[#allocation3 + $0x18] sm:$0xff] }
 0x2f0   : > { %1934 = vst.msk [vmem:[#allocation3 + $0xa0] sm:$0xff] %vm1913_vm12, %v1858_v57  ;;  %v2172_v39 = vpack.c.bf16 %v2142_v4, %v2141_v2  ;;  %v1961_v2 = vld [vmem:[#allocation2 + $0xe2] sm:$0xff] }
 0x2f1   : > { %2127 = vst.msk [vmem:[#allocation3 + $0xa0] sm:$0xff] %vm2106_vm13, %v2051_v53  ;;  %v1575_v4 = vld [vmem:[#allocation2 + $0xe0] sm:$0xff] }
 0x2f2   : > { %2552 = vmatmul.msk.bf16.gmra.mxu1 %vm2227_vm14, %v2172_v39  ;;  %v1574_v39 = vld [vmem:[#allocation2 + $0xd8] sm:$0xff] }
 0x2f3   : > { %1486 = vrot.lane.b32.xlu0 %v1972_v0, %s2704_s23  ;;  %1837 = vrot.lane.b32.xlu2 %v1763_v59, %s2705_s25  ;;  %v1767_v0 = vld [vmem:[#allocation2 + $0xd9] sm:$0xff] }
 0x2f4   : > { %1646 = vrot.lane.b32.xlu1 %v1571_v55, %s2707_s30 }
 0x2f5   : > { %v1826_v43 = vpop.permute.xlu0 %1825  ;;  %v1671_v30 = vpop.permute.xlu2 %1670 }
 0x2f6   : > { %1744 = vst.msk [vmem:[#allocation3 + $0xb8] sm:$0xff] %vm1720_vm11, %v1671_v30  ;;  %v1860_v6 = vpop.permute.xlu1 %1859 }
 0x2f7   : > { %1935 = vst.msk [vmem:[#allocation3 + $0xa8] sm:$0xff] %vm1913_vm12, %v1860_v6 }
 0x2f8   : > { %2128 = vst.msk [vmem:[#allocation3 + $0xa8] sm:$0xff] %vm2106_vm13, %v2053_v1  ;;  %v2159_v20 = vld [vmem:[#allocation3 + $0xa0] sm:$0xff] }
 0x2fb   : > { %1682 = vrot.lane.b32.xlu0 %v1589_v50, %s2707_s30  ;;  %2032 = vrot.lane.b32.xlu2 %v1957_v9, %s2706_s26  ;;  %v1960_v9 = vld [vmem:[#allocation2 + $0xda] sm:$0xff] }
 0x2fc   : > { %2030 = vrot.lane.b32.xlu1 %v1956_v45, %s2706_s26  ;;  %v1768_v45 = vld [vmem:[#allocation2 + $0xe1] sm:$0xff] }
 0x2fd   : > { %v2021_v10 = vpop.permute.xlu0 %2020  ;;  %v2055_v11 = vpop.permute.xlu2 %2054 }
 0x2fe   : > { %v1633_v15 = vpop.permute.xlu1 %1632 }
 0x2ff   : > { %1725 = vst.msk [vmem:[#allocation3 + $0x20] sm:$0xff] %vm1720_vm11, %v1633_v15  ;;  %v2160_v17 = vld [vmem:[#allocation3 + $0xa8] sm:$0xff] }
 0x300   : > { %1918 = vst.msk [vmem:[#allocation3 + $0x20] sm:$0xff] %vm1913_vm12, %v1826_v43  ;;  %v2181_v16 = vpack.c.bf16 %v2160_v17, %v2159_v20 }
 0x301   : > { %2111 = vst.msk [vmem:[#allocation3 + $0x20] sm:$0xff] %vm2106_vm13, %v2019_v47 }
 0x302   : > { %2561 = vmatmul.msk.bf16.gmra.mxu2 %vm2227_vm14, %v2181_v16 }
 0x303   : > { %2066 = vrot.lane.b32.xlu0 %v1974_v18, %s2706_s26  ;;  %1680 = vrot.lane.b32.xlu2 %v1588_v19, %s2707_s30 }
 0x304   : > { %1488 = vrot.lane.b32.xlu1 %v1973_v63, %s2704_s23  ;;  %v1784_v63 = vld [vmem:[#allocation2 + $0x1a1] sm:$0xff] }
 0x305   : > { %v1862_v58 = vpop.permute.xlu0 %1861  ;;  %v1639_v22 = vpop.permute.xlu2 %1638 }
 0x306   : > { %1728 = vst.msk [vmem:[#allocation3 + $0x38] sm:$0xff] %vm1720_vm11, %v1639_v22  ;;  %v1828_v25 = vpop.permute.xlu1 %1827 }
 0x307   : > { %1919 = vst.msk [vmem:[#allocation3 + $0x28] sm:$0xff] %vm1913_vm12, %v1828_v25 }
 0x308   : > { %2112 = vst.msk [vmem:[#allocation3 + $0x28] sm:$0xff] %vm2106_vm13, %v2021_v10  ;;  %v2143_v3 = vld [vmem:[#allocation3 + $0x20] sm:$0xff]  ;;  %v3750_v10 = vld [vmem:[%s3942_s4] ss:$0 sm:$0xff] }
 0x30b   : > { %1650 = vrot.lane.b32.xlu0 %v1573_v60, %s2707_s30  ;;  %1875 = vrot.lane.b32.xlu2 %v3420_v44, %s2705_s25  ;;  %v1975_v44 = vld [vmem:[#allocation2 + $0x18a] sm:$0xff] }
 0x30c   : > { %1873 = vrot.lane.b32.xlu1 %v1781_v23, %s2705_s25 }
 0x30d   : > { %v2057_v21 = vpop.permute.xlu0 %2056  ;;  %v2023_v12 = vpop.permute.xlu2 %2022 }
 0x30e   : > { %v1669_v38 = vpop.permute.xlu1 %1668 }
 0x30f   : > { %1743 = vst.msk [vmem:[#allocation3 + $0xb0] sm:$0xff] %vm1720_vm11, %v1669_v38  ;;  %v2144_v27 = vld [vmem:[#allocation3 + $0x28] sm:$0xff] }
 0x310   : > { %1936 = vst.msk [vmem:[#allocation3 + $0xb0] sm:$0xff] %vm1913_vm12, %v1862_v58  ;;  %v2173_v5 = vpack.c.bf16 %v2144_v27, %v2143_v3 }
 0x311   : > { %2129 = vst.msk [vmem:[#allocation3 + $0xb0] sm:$0xff] %vm2106_vm13, %v2055_v11 }
 0x312   : > { %2553 = vmatmul.msk.bf16.gmra.mxu1 %vm2227_vm14, %v2173_v5 }
 0x313   : > { %2034 = vrot.lane.b32.xlu0 %v1958_v8, %s2706_s26  ;;  %1648 = vrot.lane.b32.xlu2 %v1572_v28, %s2707_s30 }
 0x314   : > { %2068 = vrot.lane.b32.xlu1 %v1975_v44, %s2706_s26 }
 0x315   : > { %v1830_v31 = vpop.permute.xlu0 %1829  ;;  %v1675_v7 = vpop.permute.xlu2 %1674 }
 0x316   : > { %1746 = vst.msk [vmem:[#allocation3 + $0xc8] sm:$0xff] %vm1720_vm11, %v1675_v7  ;;  %v1864_v26 = vpop.permute.xlu1 %1863 }
 0x317   : > { %1937 = vst.msk [vmem:[#allocation3 + $0xb8] sm:$0xff] %vm1913_vm12, %v1864_v26 }
 0x318   : > { %2130 = vst.msk [vmem:[#allocation3 + $0xb8] sm:$0xff] %vm2106_vm13, %v2057_v21  ;;  %v2161_v35 = vld [vmem:[#allocation3 + $0xb0] sm:$0xff] }
 0x31b   : > { %1492 = vrot.lane.b32.xlu0 %v1975_v44, %s2704_s23  ;;  %1843 = vrot.lane.b32.xlu2 %v1766_v32, %s2705_s25 }
 0x31c   : > { %1841 = vrot.lane.b32.xlu1 %v1765_v54, %s2705_s25 }
 0x31d   : > { %v2025_v33 = vpop.permute.xlu0 %2024  ;;  %v2059_v49 = vpop.permute.xlu2 %2058 }
 0x31e   : > { %v1637_v24 = vpop.permute.xlu1 %1636 }
 0x31f   : > { %1727 = vst.msk [vmem:[#allocation3 + $0x30] sm:$0xff] %vm1720_vm11, %v1637_v24  ;;  %v2162_v36 = vld [vmem:[#allocation3 + $0xb8] sm:$0xff] }
 0x320   : > { %1920 = vst.msk [vmem:[#allocation3 + $0x30] sm:$0xff] %vm1913_vm12, %v1830_v31  ;;  %v2182_v40 = vpack.c.bf16 %v2162_v36, %v2161_v35 }
 0x321   : > { %2113 = vst.msk [vmem:[#allocation3 + $0x30] sm:$0xff] %vm2106_vm13, %v2023_v12 }
 0x322   : > { %2562 = vmatmul.msk.bf16.gmra.mxu2 %vm2227_vm14, %v2182_v40 }
 0x323   : > { %1877 = vrot.lane.b32.xlu0 %v1783_v13, %s2705_s25  ;;  %1490 = vrot.lane.b32.xlu2 %v1974_v18, %s2704_s23  ;;  %s2655_s23 = scalar_lea.hbm %s3943_s5, 512 }
 0x324   : > { %2036 = vrot.lane.b32.xlu1 %v1959_v41, %s2706_s26 }
 0x325   : > { %v1866_v34 = vpop.permute.xlu0 %1865  ;;  %v1643_v53 = vpop.permute.xlu2 %1642 }
 0x326   : > { %1730 = vst.msk [vmem:[#allocation3 + $0x48] sm:$0xff] %vm1720_vm11, %v1643_v53  ;;  %v1832_v14 = vpop.permute.xlu1 %1831 }
 0x327   : > { %1921 = vst.msk [vmem:[#allocation3 + $0x38] sm:$0xff] %vm1913_vm12, %v1832_v14 }
 0x328   : > { %2114 = vst.msk [vmem:[#allocation3 + $0x38] sm:$0xff] %vm2106_vm13, %v2025_v33  ;;  %v2145_v57 = vld [vmem:[#allocation3 + $0x30] sm:$0xff] }
 0x32b   : > { %2072 = vrot.lane.b32.xlu0 %v1977_v42, %s2706_s26  ;;  %1686 = vrot.lane.b32.xlu2 %v1591_v46, %s2707_s30 }
 0x32c   : > { %1684 = vrot.lane.b32.xlu1 %v1590_v48, %s2707_s30 }
 0x32d   : > { %v2061_v52 = vpop.permute.xlu0 %2060  ;;  %v2027_v37 = vpop.permute.xlu2 %2026 }
 0x32e   : > { %v1673_v56 = vpop.permute.xlu1 %1672 }
 0x32f   : > { %1745 = vst.msk [vmem:[#allocation3 + $0xc0] sm:$0xff] %vm1720_vm11, %v1673_v56  ;;  %v2146_v62 = vld [vmem:[#allocation3 + $0x38] sm:$0xff] }
 0x330   : > { %1938 = vst.msk [vmem:[#allocation3 + $0xc0] sm:$0xff] %vm1913_vm12, %v1866_v34  ;;  %v2174_v61 = vpack.c.bf16 %v2146_v62, %v2145_v57 }
 0x331   : > { %2131 = vst.msk [vmem:[#allocation3 + $0xc0] sm:$0xff] %vm2106_vm13, %v2059_v49 }
 0x332   : > { %2554 = vmatmul.msk.bf16.gmra.mxu1 %vm2227_vm14, %v2174_v61 }
 0x333   : > { %1845 = vrot.lane.b32.xlu0 %v1767_v0, %s2705_s25  ;;  %2070 = vrot.lane.b32.xlu2 %v1976_v29, %s2706_s26 }
 0x334   : > { %1879 = vrot.lane.b32.xlu1 %v1784_v63, %s2705_s25 }
 0x335   : > { %v1834_v1 = vpop.permute.xlu0 %1833  ;;  %v1485_v47 = vpop.permute.xlu2 %1484 }
 0x336   : > { %1554 = vst.msk [vmem:[#allocation3 + $0xd8] sm:$0xff] %vm1526_vm9, %v1485_v47  ;;  %v1868_v51 = vpop.permute.xlu1 %1867 }
 0x337   : > { %1939 = vst.msk [vmem:[#allocation3 + $0xc8] sm:$0xff] %vm1913_vm12, %v1868_v51 }
 0x338   : > { %2132 = vst.msk [vmem:[#allocation3 + $0xc8] sm:$0xff] %vm2106_vm13, %v2061_v52  ;;  %v2163_v30 = vld [vmem:[#allocation3 + $0xc0] sm:$0xff] }
 0x33b   : > { %2040 = vrot.lane.b32.xlu0 %v1961_v2, %s2706_s26  ;;  %1654 = vrot.lane.b32.xlu2 %v1575_v4, %s2707_s30 }
 0x33c   : > { %1652 = vrot.lane.b32.xlu1 %v1574_v39, %s2707_s30 }
 0x33d   : > { %v2029_v59 = vpop.permute.xlu0 %2028  ;;  %v1870_v55 = vpop.permute.xlu2 %1869 }
 0x33e   : > { %v1641_v43 = vpop.permute.xlu1 %1640 }
 0x33f   : > { %1729 = vst.msk [vmem:[#allocation3 + $0x40] sm:$0xff] %vm1720_vm11, %v1641_v43  ;;  %v2164_v6 = vld [vmem:[#allocation3 + $0xc8] sm:$0xff] }
 0x340   : > { %1922 = vst.msk [vmem:[#allocation3 + $0x40] sm:$0xff] %vm1913_vm12, %v1834_v1  ;;  %v2183_v50 = vpack.c.bf16 %v2164_v6, %v2163_v30 }
 0x341   : > { %2115 = vst.msk [vmem:[#allocation3 + $0x40] sm:$0xff] %vm2106_vm13, %v2027_v37 }
 0x342   : > { %2563 = vmatmul.msk.bf16.gmra.mxu2 %vm2227_vm14, %v2183_v50 }
 0x343   : > { %2038 = vrot.lane.b32.xlu2 %v1960_v9, %s2706_s26  ;;  %s3758_s26 = scalar_lea.vmem [#allocation4], %s2516_s6 }
 0x344   : > { %1847 = vrot.lane.b32.xlu1 %v1768_v45, %s2705_s25  ;;  %s2577_s25 = sshll.u32 %s2760_s22, 8  ;;  %s2447_s10 = sshll.u32 %s3758_s26, 4  ;;  %s2448_s10 = int_to_ptr.vmem [resolvable:$true] %s2447_s10 }
 0x345   : > { %v1677_v11 = vpop.permute.xlu0 %1676  ;;  %v2065_v15 = vpop.permute.xlu2 %2064  ;;  %s2446_s9 = scalar_lea.hbm %s3943_s5, %s2577_s25  ;;  %s2435_s22 = scalar_lea.sflag [#allocation5], %s215_s17 }
 0x346   : > { %v2329_v20 = vpop.f32.mrf.mxu2  ;;  %v1836_v17 = vpop.permute.xlu1 %1835  ;;  %s2449_s11 = sshll.u32 %s2446_s9, 4  ;;  %s2450_s11 = int_to_ptr.hbm [resolvable:$true] %s2449_s11 }
 0x347   : > { %v2330_v16 = vadd.f32 %v3750_v10, %v2329_v20  ;;  %1923 = vst.msk [vmem:[#allocation3 + $0x48] sm:$0xff] %vm1913_vm12, %v1836_v17  ;;  %s2649_s13 = sshra.s32 %s2450_s11, 4  ;;  %s2650_s13 = int_to_ptr.hbm [resolvable:$true] %s2649_s13 }
 0x348   : > { %2116 = vst.msk [vmem:[#allocation3 + $0x48] sm:$0xff] %vm2106_vm13, %v2029_v59  ;;  %v2147_v21 = vld [vmem:[#allocation3 + $0x40] sm:$0xff]  ;;  %s2651_s14 = scalar_lea.hbm %s2650_s13, 256  ;;  %p2656_p0 = scmp.lt.s32.totalorder %s2650_s13, %s3943_s5 }
 0x349   : > { %v2385_v18 = vmax.f32 %v2330_v16, 0.0  ;;  %p2652_p11 = scmp.ne.s32.totalorder %s2650_s13, %s2651_s14  ;;  %p2657_p1 = scmp.lt.s32.totalorder %s2655_s23, %s2651_s14 }
 0x34b   : > { %2418 = vst.msk [vmem:[%s3758_s26 + $0x80] sm:$0xff] %vm2401_vm15, %v2385_v18  ;;  %p2653_p12 = pnand %p2652_p11, %p2777_p5  ;;  %p2658_p2 = por %p2657_p1, %p2656_p0 }
 0x34d   : > { %v1872_v19 = vpop.permute.xlu0 %1871  ;;  %v1838_v58 = vpop.permute.xlu2 %1837  ;;  %p2654_p13 = pneg %p2653_p12 }
 0x34e   : > { %v2331_v22 = vpop.f32.mrf.mxu2  ;;  %v1483_v25 = vpop.permute.xlu1 %1482 }
 0x34f   : > { %v2332_v60 = vadd.f32 %v3750_v10, %v2331_v22  ;;  %1553 = vst.msk [vmem:[#allocation3 + $0xd0] sm:$0xff] %vm1526_vm9, %v1483_v25  ;;  %v2289_v23 = vpop.f32.mrf.mxu1  ;;  %v2148_v12 = vld [vmem:[#allocation3 + $0x48] sm:$0xff]  ;;  %p2659_p3 = pnand %p2658_p2, %p2654_p13 }
 0x350   : > { %1747 = vst.msk [vmem:[#allocation3 + $0xd0] sm:$0xff] %vm1720_vm11, %v1677_v11  ;;  %v2290_v38 = vadd.f32 %v3750_v10, %v2289_v23  ;;  %v2175_v3 = vpack.c.bf16 %v2148_v12, %v2147_v21 }
 0x351   : > { %v2386_v27 = vmax.f32 %v2332_v60, 0.0  ;;  %1940 = vst.msk [vmem:[#allocation3 + $0xd0] sm:$0xff] %vm1913_vm12, %v1870_v55 }
 0x352   : > { %v2369_v5 = vmax.f32 %v2290_v38, 0.0  ;;  %2555 = vmatmul.msk.bf16.gmra.mxu1 %vm2227_vm14, %v2175_v3 }
 0x353   : > { %2419 = vst.msk [vmem:[%s3758_s26 + $0x88] sm:$0xff] %vm2401_vm15, %v2386_v27 }
 0x354   : > { %2402 = vst.msk [vmem:[%s3758_s26] sm:$0xff] %vm2401_vm15, %v2369_v5 }
 0x355   : > { %v1645_v8 = vpop.permute.xlu0 %1644  ;;  %v2033_v28 = vpop.permute.xlu2 %2032 }
 0x356   : > { %1731 = vst.msk [vmem:[#allocation3 + $0x50] sm:$0xff] %vm1720_vm11, %v1645_v8  ;;  %v1679_v44 = vpop.permute.xlu1 %1678 }
 0x357   : > { %1924 = vst.msk [vmem:[#allocation3 + $0x50] sm:$0xff] %vm1913_vm12, %v1838_v58  ;;  %v2291_v31 = vpop.f32.mrf.mxu1 }
 0x358   : > { %1748 = vst.msk [vmem:[#allocation3 + $0xd8] sm:$0xff] %vm1720_vm11, %v1679_v44  ;;  %v2292_v7 = vadd.f32 %v3750_v10, %v2291_v31 }
 0x359   : > { %1941 = vst.msk [vmem:[#allocation3 + $0xd8] sm:$0xff] %vm1913_vm12, %v1872_v19 }
 0x35a   : > { %2134 = vst.msk [vmem:[#allocation3 + $0xd8] sm:$0xff] %vm2106_vm13, %v2065_v15  ;;  %v2370_v26 = vmax.f32 %v2292_v7, 0.0 }
 0x35c   : > { %2403 = vst.msk [vmem:[%s3758_s26 + $0x8] sm:$0xff] %vm2401_vm15, %v2370_v26 }
 0x35d   : > { %v1840_v32 = vpop.permute.xlu0 %1839  ;;  %v1681_v54 = vpop.permute.xlu2 %1680 }
 0x35e   : > { %v2063_v33 = vpop.permute.xlu1 %2062 }
 0x35f   : > { %2133 = vst.msk [vmem:[#allocation3 + $0xd0] sm:$0xff] %vm2106_vm13, %v2063_v33 }
 0x361   : > { %v2166_v40 = vld [vmem:[#allocation3 + $0xd8] sm:$0xff] }
 0x365   : > { %v1487_v49 = vpop.permute.xlu0 %1486  ;;  %v1876_v24 = vpop.permute.xlu2 %1875 }
 0x366   : > { %1555 = vst.msk [vmem:[#allocation3 + $0xe0] sm:$0xff] %vm1526_vm9, %v1487_v49  ;;  %v2334_v35 = vpop.f32.mrf.mxu2  ;;  %v1647_v36 = vpop.permute.xlu1 %1646  ;;  %v2165_v13 = vld [vmem:[#allocation3 + $0xd0] sm:$0xff] }
 0x367   : > { %1749 = vst.msk [vmem:[#allocation3 + $0xe0] sm:$0xff] %vm1720_vm11, %v1681_v54  ;;  %v2335_v41 = vadd.f32 %v3750_v10, %v2334_v35  ;;  %v2184_v34 = vpack.c.bf16 %v2166_v40, %v2165_v13 }
 0x368   : > { %1732 = vst.msk [vmem:[#allocation3 + $0x58] sm:$0xff] %vm1720_vm11, %v1647_v36 }
 0x369   : > { %v2387_v53 = vmax.f32 %v2335_v41, 0.0  ;;  %1925 = vst.msk [vmem:[#allocation3 + $0x58] sm:$0xff] %vm1913_vm12, %v1840_v32  ;;  %2564 = vmatmul.msk.bf16.gmra.mxu2 %vm2227_vm14, %v2184_v34 }
 0x36a   : > { %2118 = vst.msk [vmem:[#allocation3 + $0x58] sm:$0xff] %vm2106_vm13, %v2033_v28 }
 0x36b   : > { %2420 = vst.msk [vmem:[%s3758_s26 + $0x90] sm:$0xff] %vm2401_vm15, %v2387_v53 }
 0x36d   : > { %v1683_v14 = vpop.permute.xlu0 %1682  ;;  %v1649_v42 = vpop.permute.xlu2 %1648 }
 0x36e   : > { %1733 = vst.msk [vmem:[#allocation3 + $0x60] sm:$0xff] %vm1720_vm11, %v1649_v42  ;;  %v2336_v46 = vpop.f32.mrf.mxu2  ;;  %v2031_v48 = vpop.permute.xlu1 %2030 }
 0x36f   : > { %v2337_v52 = vadd.f32 %v3750_v10, %v2336_v46  ;;  %2117 = vst.msk [vmem:[#allocation3 + $0x50] sm:$0xff] %vm2106_vm13, %v2031_v48  ;;  %v2294_v37 = vpop.f32.mrf.mxu1 }
 0x370   : > { %v2295_v56 = vadd.f32 %v3750_v10, %v2294_v37 }
 0x371   : > { %v2388_v57 = vmax.f32 %v2337_v52, 0.0  ;;  %v2150_v1 = vld [vmem:[#allocation3 + $0x58] sm:$0xff] }
 0x372   : > { %v2371_v62 = vmax.f32 %v2295_v56, 0.0 }
 0x373   : > { %2421 = vst.msk [vmem:[%s3758_s26 + $0x98] sm:$0xff] %vm2401_vm15, %v2388_v57 }
 0x374   : > { %2404 = vst.msk [vmem:[%s3758_s26 + $0x10] sm:$0xff] %vm2401_vm15, %v2371_v62 }
 0x375   : > { %v2067_v29 = vpop.permute.xlu0 %2066  ;;  %v1844_v61 = vpop.permute.xlu2 %1843 }
 0x376   : > { %v1489_v63 = vpop.permute.xlu1 %1488  ;;  %v2149_v0 = vld [vmem:[#allocation3 + $0x50] sm:$0xff] }
 0x377   : > { %1556 = vst.msk [vmem:[#allocation3 + $0xe8] sm:$0xff] %vm1526_vm9, %v1489_v63  ;;  %v2296_v47 = vpop.f32.mrf.mxu1  ;;  %v2176_v51 = vpack.c.bf16 %v2150_v1, %v2149_v0 }
 0x378   : > { %1750 = vst.msk [vmem:[#allocation3 + $0xe8] sm:$0xff] %vm1720_vm11, %v1683_v14  ;;  %v2297_v2 = vadd.f32 %v3750_v10, %v2296_v47 }
 0x379   : > { %1943 = vst.msk [vmem:[#allocation3 + $0xe8] sm:$0xff] %vm1913_vm12, %v1876_v24  ;;  %2556 = vmatmul.msk.bf16.gmra.mxu1 %vm2227_vm14, %v2176_v51 }
 0x37a   : > { %v2372_v4 = vmax.f32 %v2297_v2, 0.0 }
 0x37c   : > { %2405 = vst.msk [vmem:[%s3758_s26 + $0x18] sm:$0xff] %vm2401_vm15, %v2372_v4 }
 0x37d   : > { %v1651_v39 = vpop.permute.xlu0 %1650  ;;  %v1491_v59 = vpop.permute.xlu2 %1490 }
 0x37e   : > { %1734 = vst.msk [vmem:[#allocation3 + $0x68] sm:$0xff] %vm1720_vm11, %v1651_v39  ;;  %v1874_v55 = vpop.permute.xlu1 %1873 }
 0x37f   : > { %1927 = vst.msk [vmem:[#allocation3 + $0x68] sm:$0xff] %vm1913_vm12, %v1844_v61 }
 0x380   : > { %1557 = vst.msk [vmem:[#allocation3 + $0xf0] sm:$0xff] %vm1526_vm9, %v1491_v59 }
 0x381   : > { %1942 = vst.msk [vmem:[#allocation3 + $0xe0] sm:$0xff] %vm1913_vm12, %v1874_v55 }
 0x382   : > { %2135 = vst.msk [vmem:[#allocation3 + $0xe0] sm:$0xff] %vm2106_vm13, %v2067_v29 }
 0x385   : > { %v2035_v43 = vpop.permute.xlu0 %2034  ;;  %v1687_v30 = vpop.permute.xlu2 %1686 }
 0x386   : > { %v2339_v6 = vpop.f32.mrf.mxu2  ;;  %v2069_v50 = vpop.permute.xlu1 %2068 }
 0x387   : > { %v2340_v9 = vadd.f32 %v3750_v10, %v2339_v6  ;;  %2136 = vst.msk [vmem:[#allocation3 + $0xe8] sm:$0xff] %vm2106_vm13, %v2069_v50 }
 0x389   : > { %v2389_v45 = vmax.f32 %v2340_v9, 0.0  ;;  %v2167_v16 = vld [vmem:[#allocation3 + $0xe0] sm:$0xff] }
 0x38b   : > { %2422 = vst.msk [vmem:[%s3758_s26 + $0xa0] sm:$0xff] %vm2401_vm15, %v2389_v45 }
 0x38d   : > { %v1493_v11 = vpop.permute.xlu0 %1492  ;;  %v2071_v15 = vpop.permute.xlu2 %2070 }
 0x38e   : > { %1558 = vst.msk [vmem:[#allocation3 + $0xf8] sm:$0xff] %vm1526_vm9, %v1493_v11  ;;  %v2341_v20 = vpop.f32.mrf.mxu2  ;;  %v1842_v17 = vpop.permute.xlu1 %1841  ;;  %v2168_v18 = vld [vmem:[#allocation3 + $0xe8] sm:$0xff] }
 0x38f   : > { %1752 = vst.msk [vmem:[#allocation3 + $0xf8] sm:$0xff] %vm1720_vm11, %v1687_v30  ;;  %v2342_v19 = vadd.f32 %v3750_v10, %v2341_v20  ;;  %v2299_v58 = vpop.f32.mrf.mxu1  ;;  %v2185_v22 = vpack.c.bf16 %v2168_v18, %v2167_v16 }
 0x390   : > { %1926 = vst.msk [vmem:[#allocation3 + $0x60] sm:$0xff] %vm1913_vm12, %v1842_v17  ;;  %v2300_v25 = vadd.f32 %v3750_v10, %v2299_v58 }
 0x391   : > { %v2390_v60 = vmax.f32 %v2342_v19, 0.0  ;;  %2119 = vst.msk [vmem:[#allocation3 + $0x60] sm:$0xff] %vm2106_vm13, %v2035_v43  ;;  %2565 = vmatmul.msk.bf16.gmra.mxu2 %vm2227_vm14, %v2185_v22 }
 0x392   : > { %v2373_v23 = vmax.f32 %v2300_v25, 0.0 }
 0x393   : > { %2423 = vst.msk [vmem:[%s3758_s26 + $0xa8] sm:$0xff] %vm2401_vm15, %v2390_v60 }
 0x394   : > { %2406 = vst.msk [vmem:[%s3758_s26 + $0x20] sm:$0xff] %vm2401_vm15, %v2373_v23 }
 0x395   : > { %v1655_v21 = vpop.permute.xlu2 %1654  ;;  %v1878_v27 = vpop.permute.xlu0 %1877 }
 0x396   : > { %1736 = vst.msk [vmem:[#allocation3 + $0x78] sm:$0xff] %vm1720_vm11, %v1655_v21  ;;  %v2037_v12 = vpop.permute.xlu1 %2036 }
 0x397   : > { %2120 = vst.msk [vmem:[#allocation3 + $0x68] sm:$0xff] %vm2106_vm13, %v2037_v12  ;;  %v2301_v38 = vpop.f32.mrf.mxu1 }
 0x398   : > { %v2302_v3 = vadd.f32 %v3750_v10, %v2301_v38  ;;  %v2151_v28 = vld [vmem:[#allocation3 + $0x60] sm:$0xff] }
 0x39a   : > { %v2374_v5 = vmax.f32 %v2302_v3, 0.0 }
 0x39c   : > { %2407 = vst.msk [vmem:[%s3758_s26 + $0x28] sm:$0xff] %vm2401_vm15, %v2374_v5 }
 0x39d   : > { %v2073_v7 = vpop.permute.xlu0 %2072  ;;  %v2039_v34 = vpop.permute.xlu2 %2038 }
 0x39e   : > { %v1685_v8 = vpop.permute.xlu1 %1684  ;;  %v2152_v44 = vld [vmem:[#allocation3 + $0x68] sm:$0xff] }
 0x39f   : > { %1751 = vst.msk [vmem:[#allocation3 + $0xf0] sm:$0xff] %vm1720_vm11, %v1685_v8  ;;  %v2177_v31 = vpack.c.bf16 %v2152_v44, %v2151_v28 }
 0x3a0   : > { %1944 = vst.msk [vmem:[#allocation3 + $0xf0] sm:$0xff] %vm1913_vm12, %v1878_v27 }
 0x3a1   : > { %2137 = vst.msk [vmem:[#allocation3 + $0xf0] sm:$0xff] %vm2106_vm13, %v2071_v15  ;;  %2557 = vmatmul.msk.bf16.gmra.mxu1 %vm2227_vm14, %v2177_v31 }
 0x3a5   : > { %v2344_v26 = vpop.f32.mrf.mxu2  ;;  %v1846_v49 = vpop.permute.xlu0 %1845 }
 0x3a6   : > { %v2345_v32 = vadd.f32 %v3750_v10, %v2344_v26  ;;  %v1880_v54 = vpop.permute.xlu1 %1879 }
 0x3a7   : > { %1945 = vst.msk [vmem:[#allocation3 + $0xf8] sm:$0xff] %vm1913_vm12, %v1880_v54 }
 0x3a8   : > { %v2391_v33 = vmax.f32 %v2345_v32, 0.0  ;;  %2138 = vst.msk [vmem:[#allocation3 + $0xf8] sm:$0xff] %vm2106_vm13, %v2073_v7  ;;  %v2169_v35 = vld [vmem:[#allocation3 + $0xf0] sm:$0xff] }
 0x3aa   : > { %2424 = vst.msk [vmem:[%s3758_s26 + $0xb0] sm:$0xff] %vm2401_vm15, %v2391_v33 }
 0x3ad   : > { %v2346_v24 = vpop.f32.mrf.mxu2  ;;  %v2041_v52 = vpop.permute.xlu0 %2040 }
 0x3ae   : > { %v2347_v36 = vadd.f32 %v3750_v10, %v2346_v24  ;;  %v1653_v13 = vpop.permute.xlu1 %1652 }
 0x3af   : > { %1735 = vst.msk [vmem:[#allocation3 + $0x70] sm:$0xff] %vm1720_vm11, %v1653_v13  ;;  %v2304_v40 = vpop.f32.mrf.mxu1  ;;  %v2170_v41 = vld [vmem:[#allocation3 + $0xf8] sm:$0xff] }
 0x3b0   : > { %v2392_v53 = vmax.f32 %v2347_v36, 0.0  ;;  %1928 = vst.msk [vmem:[#allocation3 + $0x70] sm:$0xff] %vm1913_vm12, %v1846_v49  ;;  %v2305_v14 = vadd.f32 %v3750_v10, %v2304_v40  ;;  %v2186_v42 = vpack.c.bf16 %v2170_v41, %v2169_v35 }
 0x3b1   : > { %2121 = vst.msk [vmem:[#allocation3 + $0x70] sm:$0xff] %vm2106_vm13, %v2039_v34 }
 0x3b2   : > { %2425 = vst.msk [vmem:[%s3758_s26 + $0xb8] sm:$0xff] %vm2401_vm15, %v2392_v53  ;;  %v2375_v46 = vmax.f32 %v2305_v14, 0.0  ;;  %2566 = vmatmul.msk.bf16.gmra.mxu2 %vm2227_vm14, %v2186_v42 }
 0x3b4   : > { %2408 = vst.msk [vmem:[%s3758_s26 + $0x30] sm:$0xff] %vm2401_vm15, %v2375_v46 }
 0x3b6   : > { %v1848_v48 = vpop.permute.xlu1 %1847 }
 0x3b7   : > { %1929 = vst.msk [vmem:[#allocation3 + $0x78] sm:$0xff] %vm1913_vm12, %v1848_v48  ;;  %v2306_v37 = vpop.f32.mrf.mxu1 }
 0x3b8   : > { %2122 = vst.msk [vmem:[#allocation3 + $0x78] sm:$0xff] %vm2106_vm13, %v2041_v52  ;;  %v2307_v56 = vadd.f32 %v3750_v10, %v2306_v37  ;;  %v2153_v62 = vld [vmem:[#allocation3 + $0x70] sm:$0xff] }
 0x3ba   : > { %v2376_v57 = vmax.f32 %v2307_v56, 0.0 }
 0x3bc   : > { %2409 = vst.msk [vmem:[%s3758_s26 + $0x38] sm:$0xff] %vm2401_vm15, %v2376_v57 }
 0x3bf   : > { %v2154_v29 = vld [vmem:[#allocation3 + $0x78] sm:$0xff] }
 0x3c0   : > { %v2178_v61 = vpack.c.bf16 %v2154_v29, %v2153_v62 }
 0x3c2   : > { %2558 = vmatmul.msk.bf16.gmra.mxu1 %vm2227_vm14, %v2178_v61 }
 0x3c5   : > { %v2349_v63 = vpop.f32.mrf.mxu2 }
 0x3c6   : > { %v2350_v0 = vadd.f32 %v3750_v10, %v2349_v63 }
 0x3c8   : > { %v2393_v1 = vmax.f32 %v2350_v0, 0.0 }
 0x3ca   : > { %2426 = vst.msk [vmem:[%s3758_s26 + $0xc0] sm:$0xff] %vm2401_vm15, %v2393_v1 }
 0x3cd   : > { %v2351_v47 = vpop.f32.mrf.mxu2 }
 0x3ce   : > { %v2352_v51 = vadd.f32 %v3750_v10, %v2351_v47 }
 0x3cf   : > { %v2309_v2 = vpop.f32.mrf.mxu1 }
 0x3d0   : > { %v2394_v4 = vmax.f32 %v2352_v51, 0.0  ;;  %v2310_v39 = vadd.f32 %v3750_v10, %v2309_v2 }
 0x3d2   : > { %2427 = vst.msk [vmem:[%s3758_s26 + $0xc8] sm:$0xff] %vm2401_vm15, %v2394_v4  ;;  %v2377_v59 = vmax.f32 %v2310_v39, 0.0 }
 0x3d4   : > { %2410 = vst.msk [vmem:[%s3758_s26 + $0x40] sm:$0xff] %vm2401_vm15, %v2377_v59 }
 0x3d7   : > { %v2311_v55 = vpop.f32.mrf.mxu1 }
 0x3d8   : > { %v2312_v43 = vadd.f32 %v3750_v10, %v2311_v55 }
 0x3da   : > { %v2378_v30 = vmax.f32 %v2312_v43, 0.0 }
 0x3dc   : > { %2411 = vst.msk [vmem:[%s3758_s26 + $0x48] sm:$0xff] %vm2401_vm15, %v2378_v30 }
 0x3ec   : > { %v2354_v6 = vpop.f32.mrf.mxu2 }
 0x3ed   : > { %v2355_v50 = vadd.f32 %v3750_v10, %v2354_v6 }
 0x3ef   : > { %v2395_v9 = vmax.f32 %v2355_v50, 0.0 }
 0x3f1   : > { %2428 = vst.msk [vmem:[%s3758_s26 + $0xd0] sm:$0xff] %vm2401_vm15, %v2395_v9 }
 0x3f4   : > { %v2356_v45 = vpop.f32.mrf.mxu2 }
 0x3f5   : > { %v2357_v11 = vadd.f32 %v3750_v10, %v2356_v45 }
 0x3f6   : > { %v2314_v15 = vpop.f32.mrf.mxu1 }
 0x3f7   : > { %v2396_v20 = vmax.f32 %v2357_v11, 0.0  ;;  %v2315_v17 = vadd.f32 %v3750_v10, %v2314_v15 }
 0x3f9   : > { %2429 = vst.msk [vmem:[%s3758_s26 + $0xd8] sm:$0xff] %vm2401_vm15, %v2396_v20  ;;  %v2379_v16 = vmax.f32 %v2315_v17, 0.0 }
 0x3fb   : > { %2412 = vst.msk [vmem:[%s3758_s26 + $0x50] sm:$0xff] %vm2401_vm15, %v2379_v16 }
 0x3fe   : > { %v2316_v18 = vpop.f32.mrf.mxu1 }
 0x3ff   : > { %v2317_v19 = vadd.f32 %v3750_v10, %v2316_v18 }
 0x401   : > { %v2380_v58 = vmax.f32 %v2317_v19, 0.0 }
 0x403   : > { %2413 = vst.msk [vmem:[%s3758_s26 + $0x58] sm:$0xff] %vm2401_vm15, %v2380_v58 }
 0x414   : > { %v2359_v22 = vpop.f32.mrf.mxu2 }
 0x415   : > { %v2360_v25 = vadd.f32 %v3750_v10, %v2359_v22 }
 0x417   : > { %v2397_v60 = vmax.f32 %v2360_v25, 0.0 }
 0x419   : > { %2430 = vst.msk [vmem:[%s3758_s26 + $0xe0] sm:$0xff] %vm2401_vm15, %v2397_v60 }
 0x41c   : > { %v2361_v23 = vpop.f32.mrf.mxu2 }
 0x41d   : > { %v2362_v21 = vadd.f32 %v3750_v10, %v2361_v23 }
 0x41e   : > { %v2319_v12 = vpop.f32.mrf.mxu1 }
 0x41f   : > { %v2398_v38 = vmax.f32 %v2362_v21, 0.0  ;;  %v2320_v3 = vadd.f32 %v3750_v10, %v2319_v12 }
 0x421   : > { %2431 = vst.msk [vmem:[%s3758_s26 + $0xe8] sm:$0xff] %vm2401_vm15, %v2398_v38  ;;  %v2381_v27 = vmax.f32 %v2320_v3, 0.0 }
 0x423   : > { %2414 = vst.msk [vmem:[%s3758_s26 + $0x60] sm:$0xff] %vm2401_vm15, %v2381_v27 }
 0x426   : > { %v2321_v5 = vpop.f32.mrf.mxu1 }
 0x427   : > { %v2322_v8 = vadd.f32 %v3750_v10, %v2321_v5 }
 0x429   : > { %v2382_v28 = vmax.f32 %v2322_v8, 0.0 }
 0x42b   : > { %2415 = vst.msk [vmem:[%s3758_s26 + $0x68] sm:$0xff] %vm2401_vm15, %v2382_v28 }
 0x435   : > { %v2364_v44 = vpop.f32.mrf.mxu2 }
 0x436   : > { %v2365_v31 = vadd.f32 %v3750_v10, %v2364_v44 }
 0x438   : > { %v2399_v7 = vmax.f32 %v2365_v31, 0.0 }
 0x43a   : > { %2432 = vst.msk [vmem:[%s3758_s26 + $0xf0] sm:$0xff] %vm2401_vm15, %v2399_v7 }
 0x43d   : > { %v2366_v26 = vpop.f32.mrf.mxu2 }
 0x43e   : > { %v2367_v32 = vadd.f32 %v3750_v10, %v2366_v26 }
 0x43f   : > { %v2324_v54 = vpop.f32.mrf.mxu1 }
 0x440   : > { %v2400_v33 = vmax.f32 %v2367_v32, 0.0  ;;  %v2325_v49 = vadd.f32 %v3750_v10, %v2324_v54 }
 0x442   : > { %2433 = vst.msk [vmem:[%s3758_s26 + $0xf8] sm:$0xff] %vm2401_vm15, %v2400_v33  ;;  %v2383_v24 = vmax.f32 %v2325_v49, 0.0 }
 0x444   : > { %2416 = vst.msk [vmem:[%s3758_s26 + $0x70] sm:$0xff] %vm2401_vm15, %v2383_v24 }
 0x447   : > { %v2326_v35 = vpop.f32.mrf.mxu1 }
 0x448   : > { %v2327_v36 = vadd.f32 %v3750_v10, %v2326_v35 }
 0x44a   : > { %v2384_v13 = vmax.f32 %v2327_v36, 0.0 }
 0x44c   : > { %2417 = vst.msk [vmem:[%s3758_s26 + $0x78] sm:$0xff] %vm2401_vm15, %v2384_v13 }
 0x44d   : > { %2662 = shalt.err (!%p2659_p3)
}
 0x44e   : > { %s2708_s17 = smov 128  }
 0x44f   : > { %2584 = dma.vmem_to_hbm [thread:$0]  (%p2777_p5), %s2448_s10, 4096, %s2450_s11, %s2435_s22, %s2708_s17, %s2708_s17, %s2700_s12  }
 0x450 PF: > { %p2590_p4 = scmp.ge.s32.totalorder %s2697_s21, 2  ;;  %s2464_s26 = sand.u32 1, %s2685_s18  }
 0x451   : > { %s2465_s25 = scalar_lea.sflag [#allocation5], %s2464_s26 }
 0x452   : > { %p2587_p7 = pnand %p2590_p4, %p2781_p6 }
 0x454   : > { %p2588_p8 = pneg %p2587_p7 }
 0x456   : > { %2680 = dma.done.wait (%p2588_p8), %s2465_s25, 4096  }
 0x457   : > { %2682 = vsyncadd (%p2588_p8), %s2465_s25, 4294963200  ;;  %p15_p9 = scmp.ge.s32.totalorder %s2764_s24, 4   ;;  %s3946_s18 = smov %s2689_s19 }
 0x458   : > { %s3947_s19 = smov %s2693_s20  ;;  %s3948_s20 = smov %s2775_s27 }
 0x459   : > { %s3949_s21 = smov %s2764_s24  ;;  %17 = sbr.rel (!%p15_p9) target bundleno = 3 (0x3), region = 78 }
 0x45e   :  { %2471 = vsyncpa [#allocation5], 1 }
 0x45f   :  { %2473 = vsyncpa [#allocation5 + $0x1], 1 }

</bundles_post_ra>
